<compile_context>
chip_gen: v7x
topology: tpu7x:2x2x1
jax: 0.10.0
libtpu: 0.0.40
codegen_flags: <defaults>
</compile_context>

<pallas_src>
import math
import jax
import jax.numpy as jnp
from jax.experimental import pallas as pl
from jax.experimental.pallas import tpu as pltpu

EPS = 1e-5


def _layernorm(x, gamma, beta):
    mu = jnp.mean(x, axis=-1, keepdims=True)
    var = jnp.mean((x - mu) ** 2, axis=-1, keepdims=True)
    return (x - mu) * jax.lax.rsqrt(var + EPS) * gamma + beta


def _divisor_tile(n, max_tile):
    """Largest divisor of n that is <= max_tile."""
    t = min(n, max_tile)
    while n % t != 0:
        t -= 1
    return t


def make_encoder_kernel(key_tile_max, ff_tile_max):
    def encoder_layer_kernel(x_ref,
                             wqkv_ref, wo_ref, w1_ref, w2_ref,
                             bqkv_ref, b1_ref, vec_ref,
                             o_ref):
        """One grid step processes a (Bt, L, C) block of the batch."""
        mxu_dtype = wqkv_ref.dtype                 # bf16 (f32 accumulation below)

        xb = x_ref[...]                            # (Bt, L, C)
        Bt, L, C = xb.shape
        d_ff = w1_ref.shape[1]
        rows = Bt * L
        x = xb.astype(jnp.float32).reshape(rows, C)

        # packed (6, C) vectors: [bo, b2, g1, be1, g2, be2]
        bo, b2 = vec_ref[0:1], vec_ref[1:2]
        g1, be1 = vec_ref[2:3], vec_ref[3:4]
        g2, be2 = vec_ref[4:5], vec_ref[5:6]

        # ---- fused QKV projection: one (rows, C) x (C, 3C) MXU matmul --------------
        qkv = jnp.dot(x.astype(mxu_dtype), wqkv_ref[...],
                      preferred_element_type=jnp.float32) + bqkv_ref[...]
        # Cast once; fold the 1/sqrt(C) softmax scale into q at the cast (O(rows*C) instead
        # of an O(rows*L) multiply over the scores).
        scale = 1.0 / math.sqrt(C)
        q = (qkv[:, 0 * C:1 * C] * scale).astype(mxu_dtype).reshape(Bt, L, C)
        k = qkv[:, 1 * C:2 * C].astype(mxu_dtype).reshape(Bt, L, C)
        v = qkv[:, 2 * C:3 * C].astype(mxu_dtype).reshape(Bt, L, C)

        # ---- flash-style attention over key tiles (online softmax) -----------------
        # TODO(synk): verify with pl.lower_as_mlir that 'bld,bmd->blm' lowers without an
        # XLU transpose of k on the target Mosaic; if it does, emit k as (Bt, C, L) instead.
        Tk = _divisor_tile(L, key_tile_max)
        m_run = l_run = acc = None
        for t in range(L // Tk):
            k_t = k[:, t * Tk:(t + 1) * Tk, :]
            v_t = v[:, t * Tk:(t + 1) * Tk, :]
            s = jnp.einsum("bld,bmd->blm", q, k_t,
                           preferred_element_type=jnp.float32)      # (Bt, L, Tk)
            s_max = jnp.max(s, axis=-1, keepdims=True)
            if t == 0:
                m_run = s_max
                p = jnp.exp(s - m_run)
                l_run = jnp.sum(p, axis=-1, keepdims=True)
                acc = jnp.einsum("blm,bmd->bld", p.astype(mxu_dtype), v_t,
                                 preferred_element_type=jnp.float32)
            else:
                m_new = jnp.maximum(m_run, s_max)
                alpha = jnp.exp(m_run - m_new)
                p = jnp.exp(s - m_new)
                l_run = alpha * l_run + jnp.sum(p, axis=-1, keepdims=True)
                acc = alpha * acc + jnp.einsum("blm,bmd->bld", p.astype(mxu_dtype), v_t,
                                               preferred_element_type=jnp.float32)
                m_run = m_new
        ctx = acc * pl.reciprocal(l_run, approx=True)                # (Bt, L, C)

        attn = jnp.dot(ctx.reshape(rows, C).astype(mxu_dtype), wo_ref[...],
                       preferred_element_type=jnp.float32) + bo

        # ---- residual + norm1 (dropout == identity; f32 VPU math) ------------------
        xn = _layernorm(x + attn, g1, be1)
        xn_mxu = xn.astype(mxu_dtype)

        # ---- FFN (1x1 convs == channel matmuls), chunked over d_ff -----------------
        Tf = _divisor_tile(d_ff, ff_tile_max)
        y = None
        for c in range(d_ff // Tf):
            c0, c1 = c * Tf, (c + 1) * Tf
            h = jnp.dot(xn_mxu, w1_ref[:, c0:c1],
                        preferred_element_type=jnp.float32) + b1_ref[:, c0:c1]
            h = jnp.maximum(h, 0.0)                                   # relu
            y_c = jnp.dot(h.astype(mxu_dtype), w2_ref[c0:c1, :],
                          preferred_element_type=jnp.float32)
            y = y_c if y is None else y + y_c
        y = y + b2

        # ---- residual + norm2 -------------------------------------------------------
        out = _layernorm(xn + y, g2, be2)
        o_ref[...] = out.reshape(Bt, L, C).astype(o_ref.dtype)

    return encoder_layer_kernel


def _chip_kind():
    try:
        return jax.devices()[0].device_kind.lower()
    except Exception:
        return ""


def _choose_block_batch(N, L, *, target_rows, min_steps, prefer_even_steps):
    """Fold batch elements so each grid step has ~target_rows matmul rows, subject to the
    per-chip grid-step constraints (min_steps for dual-TC v7x, even step counts preferred)."""
    cands = []
    for d in range(1, N + 1):
        if N % d != 0:
            continue
        if d > 1 and d * L > target_rows:
            continue
        steps = N // d
        if steps < min_steps and N >= min_steps:
            continue
        cands.append(d)
    if not cands:
        cands = [1]
    if prefer_even_steps:
        even = [d for d in cands if (N // d) % 2 == 0]
        if even:
            cands = even
    aligned = [d for d in cands if (d * L) % 256 == 0]   # fill the 256-wide MXU when possible
    pool = aligned if aligned else cands
    return max(pool)


def _vmem_limit_bytes():
    # Raise the scoped-VMEM budget; cap at 75% of physical so it stays legal on v7x (64 MiB)
    # as well as v5e/v6e (128 MiB).
    try:
        cap = pltpu.get_tpu_info().vmem_capacity_bytes
        return int(cap) * 3 // 4
    except Exception:
        return None


def encoder_layer(x, params, *, compute_dtype=jnp.bfloat16):
    N, L, C = x.shape
    d_ff = params["w1"].shape[1]

    kind = _chip_kind()
    is_v7 = "v7" in kind
    if is_v7:
        target_rows, min_steps, prefer_even = 512, 2, True
        key_tile_max, ff_tile_max = 256, 1024          # 64 MiB VMEM: keep intermediates small
    else:
        target_rows, min_steps, prefer_even = 1024, 1, False   # single TC: fewer, larger steps
        key_tile_max, ff_tile_max = 512, 4096

    Bt = _choose_block_batch(N, L, target_rows=target_rows,
                             min_steps=min_steps, prefer_even_steps=prefer_even)
    assert N % Bt == 0

    # --- fuse / pack constants on the host side -------------------------------------
    wqkv = jnp.concatenate([params["wq"], params["wk"], params["wv"]], axis=1)
    bqkv = jnp.concatenate([params["bq"], params["bk"], params["bv"]], axis=1)
    vecs = jnp.concatenate([params["bo"], params["b2"], params["g1"],
                            params["be1"], params["g2"], params["be2"]], axis=0)

    wqkv = wqkv.astype(compute_dtype)
    wo = params["wo"].astype(compute_dtype)
    w1 = params["w1"].astype(compute_dtype)
    w2 = params["w2"].astype(compute_dtype)
    bqkv = bqkv.astype(jnp.float32)
    b1 = params["b1"].astype(jnp.float32)
    vecs = vecs.astype(jnp.float32)

    kernel = make_encoder_kernel(key_tile_max, ff_tile_max)

    # advisory cost hint for the XLA scheduler around this fused custom call
    flops = 2 * N * L * (4 * C * C + 2 * C * d_ff + 2 * L * C)
    transcendentals = N * L * L + 2 * N * L
    bytes_accessed = (2 * 4 * N * L * C
                      + 2 * (4 * C * C + 2 * C * d_ff)
                      + 4 * (3 * C + d_ff + 6 * C))
    cost = pl.CostEstimate(flops=flops, transcendentals=transcendentals,
                           bytes_accessed=bytes_accessed)

    cp_kwargs = dict(dimension_semantics=("parallel",))
    vmem_limit = _vmem_limit_bytes()
    if vmem_limit is not None:
        cp_kwargs["vmem_limit_bytes"] = vmem_limit

    def build_and_run(single_buffer_consts):
        def const_spec(shape):
            # constant operand: same block every grid step (no re-DMA across steps)
            if single_buffer_consts:
                return pl.BlockSpec(shape, lambda n: (0, 0), pipeline_mode=pl.Buffered(1))
            return pl.BlockSpec(shape, lambda n: (0, 0))

        in_specs = [
            pl.BlockSpec((Bt, L, C), lambda n: (n, 0, 0)),   # x
            const_spec((C, 3 * C)),                          # fused Wqkv   (bf16)
            const_spec((C, C)),                              # Wo           (bf16)
            const_spec((C, d_ff)),                           # conv1 weight (bf16)
            const_spec((d_ff, C)),                           # conv2 weight (bf16)
            const_spec((1, 3 * C)),                          # fused bqkv   (f32)
            const_spec((1, d_ff)),                           # conv1 bias   (f32)
            const_spec((6, C)),                              # packed bo,b2,g1,be1,g2,be2 (f32)
        ]
        fn = pl.pallas_call(
            kernel,
            out_shape=jax.ShapeDtypeStruct((N, L, C), x.dtype),
            grid_spec=pltpu.PrefetchScalarGridSpec(
                num_scalar_prefetch=0,
                grid=(N // Bt,),
                in_specs=in_specs,
                out_specs=pl.BlockSpec((Bt, L, C), lambda n: (n, 0, 0)),
            ),
            compiler_params=pltpu.CompilerParams(**cp_kwargs),
            cost_estimate=cost,
        )
        return fn(x, wqkv, wo, w1, w2, bqkv, b1, vecs)

    # Prefer single-buffered constant operands (halves resident weight VMEM); fall back to
    # default double-buffering if this jax version rejects Buffered(1).
    if hasattr(pl, "Buffered"):
        try:
            return build_and_run(True)
        except Exception:
            pass
    return build_and_run(False)


def encoder_layer_ref(x, params):
    """Pure-JAX f32 reference mirroring the PyTorch forward (eval mode)."""
    C = x.shape[-1]
    q = x @ params["wq"] + params["bq"]
    k = x @ params["wk"] + params["bk"]
    v = x @ params["wv"] + params["bv"]
    s = jnp.einsum("nld,nmd->nlm", q, k) / math.sqrt(C)
    p = jax.nn.softmax(s, axis=-1)
    attn = jnp.einsum("nlm,nmd->nld", p, v) @ params["wo"] + params["bo"]
    x = x + attn
    xn = _layernorm(x, params["g1"], params["be1"])
    y = jax.nn.relu(xn @ params["w1"] + params["b1"])
    y = y @ params["w2"] + params["b2"]
    return _layernorm(xn + y, params["g2"], params["be2"])


def make_params(key, d_model, d_ff):
    keys = jax.random.split(key, 12)
    scale_m = 1.0 / math.sqrt(d_model)
    scale_f = 1.0 / math.sqrt(d_ff)
    return {
        "wq": jax.random.normal(keys[0], (d_model, d_model), jnp.float32) * scale_m,
        "wk": jax.random.normal(keys[1], (d_model, d_model), jnp.float32) * scale_m,
        "wv": jax.random.normal(keys[2], (d_model, d_model), jnp.float32) * scale_m,
        "wo": jax.random.normal(keys[3], (d_model, d_model), jnp.float32) * scale_m,
        "bq": jax.random.normal(keys[4], (1, d_model), jnp.float32) * 0.01,
        "bk": jax.random.normal(keys[5], (1, d_model), jnp.float32) * 0.01,
        "bv": jax.random.normal(keys[6], (1, d_model), jnp.float32) * 0.01,
        "bo": jax.random.normal(keys[7], (1, d_model), jnp.float32) * 0.01,
        # conv1: PyTorch weight (d_ff, d_model, 1) -> stored transposed as (d_model, d_ff)
        "w1": jax.random.normal(keys[8], (d_model, d_ff), jnp.float32) * scale_m,
        "b1": jax.random.normal(keys[9], (1, d_ff), jnp.float32) * 0.01,
        # conv2: PyTorch weight (d_model, d_ff, 1) -> stored transposed as (d_ff, d_model)
        "w2": jax.random.normal(keys[10], (d_ff, d_model), jnp.float32) * scale_f,
        "b2": jax.random.normal(keys[11], (1, d_model), jnp.float32) * 0.01,
        "g1": jnp.ones((1, d_model), jnp.float32),
        "be1": jnp.zeros((1, d_model), jnp.float32),
        "g2": jnp.ones((1, d_model), jnp.float32),
        "be2": jnp.zeros((1, d_model), jnp.float32),
    }


if __name__ == "__main__":
    N, L, d_model = 2, 8, 32
    d_ff = 4 * d_model  # 128

    key = jax.random.PRNGKey(0)
    kx, kp = jax.random.split(key)
    x = jax.random.normal(kx, (N, L, d_model), jnp.float32)
    params = make_params(kp, d_model, d_ff)

    out = encoder_layer(x, params)
    out = jax.block_until_ready(out)

    ref = encoder_layer_ref(x, params)
    assert out.shape == (N, L, d_model)
    # bf16 MXU operands (f32 accumulation) + approx softmax reciprocal -> ~1e-2-level error
    # vs the all-f32 reference; tolerance chosen accordingly.
    assert jnp.allclose(out, ref, atol=5e-2, rtol=5e-2), \
        f"max abs err {jnp.max(jnp.abs(out - ref))}"

    print("KERNEL_OK")
</pallas_src>

<mosaic_0001>
module attributes {stable_mosaic.version = 11 : i64} {
  func.func @encoder_layer_kernel(%arg0: i32, %arg1: memref<2x8x32xf32, #tpu.memory_space<vmem>>, %arg2: memref<32x96xbf16, #tpu.memory_space<vmem>>, %arg3: memref<32x32xbf16, #tpu.memory_space<vmem>>, %arg4: memref<32x128xbf16, #tpu.memory_space<vmem>>, %arg5: memref<128x32xbf16, #tpu.memory_space<vmem>>, %arg6: memref<1x96xf32, #tpu.memory_space<vmem>>, %arg7: memref<1x128xf32, #tpu.memory_space<vmem>>, %arg8: memref<6x32xf32, #tpu.memory_space<vmem>>, %arg9: memref<2x8x32xf32, #tpu.memory_space<vmem>>) attributes {dimension_semantics = [#tpu.dimension_semantics<parallel>], iteration_bounds = array<i64: 1>, scalar_prefetch = 0 : i64, scratch_operands = 0 : i64, tpu.core_type = #tpu.core_type<tc>, window_params = [{transform_indices = @transform_0, window_bounds = array<i64: 2, 8, 32>}, {pipeline_mode = #tpu.pipeline_mode<synchronous>, transform_indices = @transform_1, window_bounds = array<i64: 32, 96>}, {pipeline_mode = #tpu.pipeline_mode<synchronous>, transform_indices = @transform_2, window_bounds = array<i64: 32, 32>}, {pipeline_mode = #tpu.pipeline_mode<synchronous>, transform_indices = @transform_3, window_bounds = array<i64: 32, 128>}, {pipeline_mode = #tpu.pipeline_mode<synchronous>, transform_indices = @transform_4, window_bounds = array<i64: 128, 32>}, {pipeline_mode = #tpu.pipeline_mode<synchronous>, transform_indices = @transform_5, window_bounds = array<i64: 1, 96>}, {pipeline_mode = #tpu.pipeline_mode<synchronous>, transform_indices = @transform_6, window_bounds = array<i64: 1, 128>}, {pipeline_mode = #tpu.pipeline_mode<synchronous>, transform_indices = @transform_7, window_bounds = array<i64: 6, 32>}, {transform_indices = @transform_8, window_bounds = array<i64: 2, 8, 32>}]} {
    %c0 = arith.constant 0 : index
    %c0_0 = arith.constant 0 : index
    %c0_1 = arith.constant 0 : index
    %0 = vector.load %arg1[%c0, %c0_0, %c0_1] : memref<2x8x32xf32, #tpu.memory_space<vmem>>, vector<2x8x32xf32>
    %1 = vector.shape_cast %0 : vector<2x8x32xf32> to vector<16x32xf32>
    %c0_2 = arith.constant 0 : index
    %c0_3 = arith.constant 0 : index
    %2 = vector.load %arg8[%c0_2, %c0_3] : memref<6x32xf32, #tpu.memory_space<vmem>>, vector<1x32xf32>
    %c1 = arith.constant 1 : index
    %c0_4 = arith.constant 0 : index
    %3 = vector.load %arg8[%c1, %c0_4] : memref<6x32xf32, #tpu.memory_space<vmem>>, vector<1x32xf32>
    %c2 = arith.constant 2 : index
    %c0_5 = arith.constant 0 : index
    %4 = vector.load %arg8[%c2, %c0_5] : memref<6x32xf32, #tpu.memory_space<vmem>>, vector<1x32xf32>
    %c3 = arith.constant 3 : index
    %c0_6 = arith.constant 0 : index
    %5 = vector.load %arg8[%c3, %c0_6] : memref<6x32xf32, #tpu.memory_space<vmem>>, vector<1x32xf32>
    %c4 = arith.constant 4 : index
    %c0_7 = arith.constant 0 : index
    %6 = vector.load %arg8[%c4, %c0_7] : memref<6x32xf32, #tpu.memory_space<vmem>>, vector<1x32xf32>
    %c5 = arith.constant 5 : index
    %c0_8 = arith.constant 0 : index
    %7 = vector.load %arg8[%c5, %c0_8] : memref<6x32xf32, #tpu.memory_space<vmem>>, vector<1x32xf32>
    %8 = arith.truncf %1 : vector<16x32xf32> to vector<16x32xbf16>
    %c0_9 = arith.constant 0 : index
    %c0_10 = arith.constant 0 : index
    %9 = vector.load %arg2[%c0_9, %c0_10] : memref<32x96xbf16, #tpu.memory_space<vmem>>, vector<32x96xbf16>
    %cst = arith.constant dense<0.000000e+00> : vector<16x96xf32>
    %10 = tpu.matmul %8, %9, %cst {dimension_numbers = #tpu.dot_dimension_numbers<[1], [0], [0], [1], [0, 0, 1, 1], [], []>} : vector<16x32xbf16>, vector<32x96xbf16>, vector<16x96xf32> -> vector<16x96xf32>
    %c0_11 = arith.constant 0 : index
    %c0_12 = arith.constant 0 : index
    %11 = vector.load %arg6[%c0_11, %c0_12] : memref<1x96xf32, #tpu.memory_space<vmem>>, vector<1x96xf32>
    %12 = vector.broadcast %11 : vector<1x96xf32> to vector<16x96xf32>
    %13 = arith.addf %10, %12 : vector<16x96xf32>
    %14 = vector.extract_strided_slice %13 {offsets = [0, 0], sizes = [16, 32], strides = [1, 1]} : vector<16x96xf32> to vector<16x32xf32>
    %cst_13 = arith.constant 0.176776692 : f32
    %15 = vector.broadcast %cst_13 : f32 to vector<16x32xf32>
    %16 = arith.mulf %14, %15 : vector<16x32xf32>
    %17 = arith.truncf %16 : vector<16x32xf32> to vector<16x32xbf16>
    %18 = vector.shape_cast %17 : vector<16x32xbf16> to vector<2x8x32xbf16>
    %19 = vector.extract_strided_slice %13 {offsets = [0, 32], sizes = [16, 32], strides = [1, 1]} : vector<16x96xf32> to vector<16x32xf32>
    %20 = arith.truncf %19 : vector<16x32xf32> to vector<16x32xbf16>
    %21 = vector.shape_cast %20 : vector<16x32xbf16> to vector<2x8x32xbf16>
    %22 = vector.extract_strided_slice %13 {offsets = [0, 64], sizes = [16, 32], strides = [1, 1]} : vector<16x96xf32> to vector<16x32xf32>
    %23 = arith.truncf %22 : vector<16x32xf32> to vector<16x32xbf16>
    %24 = vector.shape_cast %23 : vector<16x32xbf16> to vector<2x8x32xbf16>
    "tpu.trace_start"() <{level = 10 : i32, message = "bld,bmd->blm"}> : () -> ()
    %cst_14 = arith.constant dense<0.000000e+00> : vector<2x8x8xf32>
    %25 = tpu.matmul %18, %21, %cst_14 {dimension_numbers = #tpu.dot_dimension_numbers<[2], [2], [1], [1], [0, 0, 0, 1, 1, 1], [0], [0]>} : vector<2x8x32xbf16>, vector<2x8x32xbf16>, vector<2x8x8xf32> -> vector<2x8x8xf32>
    "tpu.trace_stop"() : () -> ()
    %cst_15 = arith.constant dense<0xFF800000> : vector<2x8xf32>
    %26 = vector.multi_reduction <maximumf>, %25, %cst_15 [2] : vector<2x8x8xf32> to vector<2x8xf32>
    %27 = vector.shape_cast %26 : vector<2x8xf32> to vector<2x8x1xf32>
    %28 = vector.broadcast %27 : vector<2x8x1xf32> to vector<2x8x8xf32>
    %29 = arith.subf %25, %28 : vector<2x8x8xf32>
    %30 = math.exp %29 : vector<2x8x8xf32>
    %cst_16 = arith.constant dense<0.000000e+00> : vector<2x8xf32>
    %31 = vector.multi_reduction <add>, %30, %cst_16 [2] : vector<2x8x8xf32> to vector<2x8xf32>
    %32 = vector.shape_cast %31 : vector<2x8xf32> to vector<2x8x1xf32>
    %33 = arith.truncf %30 : vector<2x8x8xf32> to vector<2x8x8xbf16>
    "tpu.trace_start"() <{level = 10 : i32, message = "blm,bmd->bld"}> : () -> ()
    %cst_17 = arith.constant dense<0.000000e+00> : vector<2x8x32xf32>
    %34 = tpu.matmul %33, %24, %cst_17 {dimension_numbers = #tpu.dot_dimension_numbers<[2], [1], [1], [2], [0, 0, 0, 1, 1, 2], [0], [0]>} : vector<2x8x8xbf16>, vector<2x8x32xbf16>, vector<2x8x32xf32> -> vector<2x8x32xf32>
    "tpu.trace_stop"() : () -> ()
    %35 = tpu.reciprocal %32 {approx = true} : vector<2x8x1xf32> -> vector<2x8x1xf32>
    %36 = vector.broadcast %35 : vector<2x8x1xf32> to vector<2x8x32xf32>
    %37 = arith.mulf %34, %36 : vector<2x8x32xf32>
    %38 = vector.shape_cast %37 : vector<2x8x32xf32> to vector<16x32xf32>
    %39 = arith.truncf %38 : vector<16x32xf32> to vector<16x32xbf16>
    %c0_18 = arith.constant 0 : index
    %c0_19 = arith.constant 0 : index
    %40 = vector.load %arg3[%c0_18, %c0_19] : memref<32x32xbf16, #tpu.memory_space<vmem>>, vector<32x32xbf16>
    %cst_20 = arith.constant dense<0.000000e+00> : vector<16x32xf32>
    %41 = tpu.matmul %39, %40, %cst_20 {dimension_numbers = #tpu.dot_dimension_numbers<[1], [0], [0], [1], [0, 0, 1, 1], [], []>} : vector<16x32xbf16>, vector<32x32xbf16>, vector<16x32xf32> -> vector<16x32xf32>
    %42 = vector.broadcast %2 : vector<1x32xf32> to vector<16x32xf32>
    %43 = arith.addf %41, %42 : vector<16x32xf32>
    %44 = arith.addf %1, %43 : vector<16x32xf32>
    %cst_21 = arith.constant dense<0.000000e+00> : vector<16xf32>
    %45 = vector.multi_reduction <add>, %44, %cst_21 [1] : vector<16x32xf32> to vector<16xf32>
    %46 = vector.shape_cast %45 : vector<16xf32> to vector<16x1xf32>
    %cst_22 = arith.constant 3.200000e+01 : f32
    %47 = vector.broadcast %cst_22 : f32 to vector<16x1xf32>
    %48 = arith.divf %46, %47 : vector<16x1xf32>
    %49 = vector.broadcast %48 : vector<16x1xf32> to vector<16x32xf32>
    %50 = arith.subf %44, %49 : vector<16x32xf32>
    %51 = arith.mulf %50, %50 : vector<16x32xf32>
    %cst_23 = arith.constant dense<0.000000e+00> : vector<16xf32>
    %52 = vector.multi_reduction <add>, %51, %cst_23 [1] : vector<16x32xf32> to vector<16xf32>
    %53 = vector.shape_cast %52 : vector<16xf32> to vector<16x1xf32>
    %cst_24 = arith.constant 3.200000e+01 : f32
    %54 = vector.broadcast %cst_24 : f32 to vector<16x1xf32>
    %55 = arith.divf %53, %54 : vector<16x1xf32>
    %56 = vector.broadcast %48 : vector<16x1xf32> to vector<16x32xf32>
    %57 = arith.subf %44, %56 : vector<16x32xf32>
    %cst_25 = arith.constant 9.99999974E-6 : f32
    %58 = vector.broadcast %cst_25 : f32 to vector<16x1xf32>
    %59 = arith.addf %55, %58 : vector<16x1xf32>
    %60 = math.rsqrt %59 : vector<16x1xf32>
    %61 = vector.broadcast %60 : vector<16x1xf32> to vector<16x32xf32>
    %62 = arith.mulf %57, %61 : vector<16x32xf32>
    %63 = vector.broadcast %4 : vector<1x32xf32> to vector<16x32xf32>
    %64 = arith.mulf %62, %63 : vector<16x32xf32>
    %65 = vector.broadcast %5 : vector<1x32xf32> to vector<16x32xf32>
    %66 = arith.addf %64, %65 : vector<16x32xf32>
    %67 = arith.truncf %66 : vector<16x32xf32> to vector<16x32xbf16>
    %c0_26 = arith.constant 0 : index
    %c0_27 = arith.constant 0 : index
    %68 = vector.load %arg4[%c0_26, %c0_27] : memref<32x128xbf16, #tpu.memory_space<vmem>>, vector<32x128xbf16>
    %cst_28 = arith.constant dense<0.000000e+00> : vector<16x128xf32>
    %69 = tpu.matmul %67, %68, %cst_28 {dimension_numbers = #tpu.dot_dimension_numbers<[1], [0], [0], [1], [0, 0, 1, 1], [], []>} : vector<16x32xbf16>, vector<32x128xbf16>, vector<16x128xf32> -> vector<16x128xf32>
    %c0_29 = arith.constant 0 : index
    %c0_30 = arith.constant 0 : index
    %70 = vector.load %arg7[%c0_29, %c0_30] : memref<1x128xf32, #tpu.memory_space<vmem>>, vector<1x128xf32>
    %71 = vector.broadcast %70 : vector<1x128xf32> to vector<16x128xf32>
    %72 = arith.addf %69, %71 : vector<16x128xf32>
    %cst_31 = arith.constant 0.000000e+00 : f32
    %73 = vector.broadcast %cst_31 : f32 to vector<16x128xf32>
    %74 = arith.maximumf %72, %73 : vector<16x128xf32>
    %75 = arith.truncf %74 : vector<16x128xf32> to vector<16x128xbf16>
    %c0_32 = arith.constant 0 : index
    %c0_33 = arith.constant 0 : index
    %76 = vector.load %arg5[%c0_32, %c0_33] : memref<128x32xbf16, #tpu.memory_space<vmem>>, vector<128x32xbf16>
    %cst_34 = arith.constant dense<0.000000e+00> : vector<16x32xf32>
    %77 = tpu.matmul %75, %76, %cst_34 {dimension_numbers = #tpu.dot_dimension_numbers<[1], [0], [0], [1], [0, 0, 1, 1], [], []>} : vector<16x128xbf16>, vector<128x32xbf16>, vector<16x32xf32> -> vector<16x32xf32>
    %78 = vector.broadcast %3 : vector<1x32xf32> to vector<16x32xf32>
    %79 = arith.addf %77, %78 : vector<16x32xf32>
    %80 = arith.addf %66, %79 : vector<16x32xf32>
    %cst_35 = arith.constant dense<0.000000e+00> : vector<16xf32>
    %81 = vector.multi_reduction <add>, %80, %cst_35 [1] : vector<16x32xf32> to vector<16xf32>
    %82 = vector.shape_cast %81 : vector<16xf32> to vector<16x1xf32>
    %cst_36 = arith.constant 3.200000e+01 : f32
    %83 = vector.broadcast %cst_36 : f32 to vector<16x1xf32>
    %84 = arith.divf %82, %83 : vector<16x1xf32>
    %85 = vector.broadcast %84 : vector<16x1xf32> to vector<16x32xf32>
    %86 = arith.subf %80, %85 : vector<16x32xf32>
    %87 = arith.mulf %86, %86 : vector<16x32xf32>
    %cst_37 = arith.constant dense<0.000000e+00> : vector<16xf32>
    %88 = vector.multi_reduction <add>, %87, %cst_37 [1] : vector<16x32xf32> to vector<16xf32>
    %89 = vector.shape_cast %88 : vector<16xf32> to vector<16x1xf32>
    %cst_38 = arith.constant 3.200000e+01 : f32
    %90 = vector.broadcast %cst_38 : f32 to vector<16x1xf32>
    %91 = arith.divf %89, %90 : vector<16x1xf32>
    %92 = vector.broadcast %84 : vector<16x1xf32> to vector<16x32xf32>
    %93 = arith.subf %80, %92 : vector<16x32xf32>
    %cst_39 = arith.constant 9.99999974E-6 : f32
    %94 = vector.broadcast %cst_39 : f32 to vector<16x1xf32>
    %95 = arith.addf %91, %94 : vector<16x1xf32>
    %96 = math.rsqrt %95 : vector<16x1xf32>
    %97 = vector.broadcast %96 : vector<16x1xf32> to vector<16x32xf32>
    %98 = arith.mulf %93, %97 : vector<16x32xf32>
    %99 = vector.broadcast %6 : vector<1x32xf32> to vector<16x32xf32>
    %100 = arith.mulf %98, %99 : vector<16x32xf32>
    %101 = vector.broadcast %7 : vector<1x32xf32> to vector<16x32xf32>
    %102 = arith.addf %100, %101 : vector<16x32xf32>
    %103 = vector.shape_cast %102 : vector<16x32xf32> to vector<2x8x32xf32>
    %c0_40 = arith.constant 0 : index
    %c0_41 = arith.constant 0 : index
    %c0_42 = arith.constant 0 : index
    %104 = vector.load %arg9[%c0_40, %c0_41, %c0_42] : memref<2x8x32xf32, #tpu.memory_space<vmem>>, vector<2x8x32xf32>
    tpu.vector_store %arg9[%c0_40, %c0_41, %c0_42], %103 {strides = array<i32>} : memref<2x8x32xf32, #tpu.memory_space<vmem>>, vector<2x8x32xf32>,
    return
  }
  func.func @transform_0(%arg0: i32) -> (i32, i32, i32) {
    %c0_i32 = arith.constant 0 : i32
    %c0_i32_0 = arith.constant 0 : i32
    %c0_i32_1 = arith.constant 0 : i32
    return %arg0, %c0_i32, %c0_i32_0 : i32, i32, i32
  }
  func.func @transform_1(%arg0: i32) -> (i32, i32) {
    %c0_i32 = arith.constant 0 : i32
    %c0_i32_0 = arith.constant 0 : i32
    %c0_i32_1 = arith.constant 0 : i32
    return %c0_i32, %c0_i32_0 : i32, i32
  }
  func.func @transform_2(%arg0: i32) -> (i32, i32) {
    %c0_i32 = arith.constant 0 : i32
    %c0_i32_0 = arith.constant 0 : i32
    %c0_i32_1 = arith.constant 0 : i32
    return %c0_i32, %c0_i32_0 : i32, i32
  }
  func.func @transform_3(%arg0: i32) -> (i32, i32) {
    %c0_i32 = arith.constant 0 : i32
    %c0_i32_0 = arith.constant 0 : i32
    %c0_i32_1 = arith.constant 0 : i32
    return %c0_i32, %c0_i32_0 : i32, i32
  }
  func.func @transform_4(%arg0: i32) -> (i32, i32) {
    %c0_i32 = arith.constant 0 : i32
    %c0_i32_0 = arith.constant 0 : i32
    %c0_i32_1 = arith.constant 0 : i32
    return %c0_i32, %c0_i32_0 : i32, i32
  }
  func.func @transform_5(%arg0: i32) -> (i32, i32) {
    %c0_i32 = arith.constant 0 : i32
    %c0_i32_0 = arith.constant 0 : i32
    %c0_i32_1 = arith.constant 0 : i32
    return %c0_i32, %c0_i32_0 : i32, i32
  }
  func.func @transform_6(%arg0: i32) -> (i32, i32) {
    %c0_i32 = arith.constant 0 : i32
    %c0_i32_0 = arith.constant 0 : i32
    %c0_i32_1 = arith.constant 0 : i32
    return %c0_i32, %c0_i32_0 : i32, i32
  }
  func.func @transform_7(%arg0: i32) -> (i32, i32) {
    %c0_i32 = arith.constant 0 : i32
    %c0_i32_0 = arith.constant 0 : i32
    %c0_i32_1 = arith.constant 0 : i32
    return %c0_i32, %c0_i32_0 : i32, i32
  }
  func.func @transform_8(%arg0: i32) -> (i32, i32, i32) {
    %c0_i32 = arith.constant 0 : i32
    %c0_i32_0 = arith.constant 0 : i32
    %c0_i32_1 = arith.constant 0 : i32
    return %arg0, %c0_i32, %c0_i32_0 : i32, i32, i32
  }
}

module attributes {stable_mosaic.version = 11 : i64} {
  func.func @encoder_layer_kernel(%arg0: i32, %arg1: memref<2x8x32xf32, #tpu.memory_space<vmem>>, %arg2: memref<32x96xbf16, #tpu.memory_space<vmem>>, %arg3: memref<32x32xbf16, #tpu.memory_space<vmem>>, %arg4: memref<32x128xbf16, #tpu.memory_space<vmem>>, %arg5: memref<128x32xbf16, #tpu.memory_space<vmem>>, %arg6: memref<1x96xf32, #tpu.memory_space<vmem>>, %arg7: memref<1x128xf32, #tpu.memory_space<vmem>>, %arg8: memref<6x32xf32, #tpu.memory_space<vmem>>, %arg9: memref<2x8x32xf32, #tpu.memory_space<vmem>>) attributes {dimension_semantics = [#tpu.dimension_semantics<parallel>], iteration_bounds = array<i64: 1>, scalar_prefetch = 0 : i64, scratch_operands = 0 : i64, tpu.core_type = #tpu.core_type<tc>, window_params = [{transform_indices = @transform_0, window_bounds = array<i64: 2, 8, 32>}, {pipeline_mode = #tpu.pipeline_mode<synchronous>, transform_indices = @transform_1, window_bounds = array<i64: 32, 96>}, {pipeline_mode = #tpu.pipeline_mode<synchronous>, transform_indices = @transform_2, window_bounds = array<i64: 32, 32>}, {pipeline_mode = #tpu.pipeline_mode<synchronous>, transform_indices = @transform_3, window_bounds = array<i64: 32, 128>}, {pipeline_mode = #tpu.pipeline_mode<synchronous>, transform_indices = @transform_4, window_bounds = array<i64: 128, 32>}, {pipeline_mode = #tpu.pipeline_mode<synchronous>, transform_indices = @transform_5, window_bounds = array<i64: 1, 96>}, {pipeline_mode = #tpu.pipeline_mode<synchronous>, transform_indices = @transform_6, window_bounds = array<i64: 1, 128>}, {pipeline_mode = #tpu.pipeline_mode<synchronous>, transform_indices = @transform_7, window_bounds = array<i64: 6, 32>}, {transform_indices = @transform_8, window_bounds = array<i64: 2, 8, 32>}]} {
    %c0 = arith.constant 0 : index
    %c0_0 = arith.constant 0 : index
    %c0_1 = arith.constant 0 : index
    %0 = vector.load %arg1[%c0, %c0_0, %c0_1] : memref<2x8x32xf32, #tpu.memory_space<vmem>>, vector<2x8x32xf32>
    %1 = vector.shape_cast %0 : vector<2x8x32xf32> to vector<16x32xf32>
    %c0_2 = arith.constant 0 : index
    %c0_3 = arith.constant 0 : index
    %2 = vector.load %arg8[%c0_2, %c0_3] : memref<6x32xf32, #tpu.memory_space<vmem>>, vector<1x32xf32>
    %c1 = arith.constant 1 : index
    %c0_4 = arith.constant 0 : index
    %3 = vector.load %arg8[%c1, %c0_4] : memref<6x32xf32, #tpu.memory_space<vmem>>, vector<1x32xf32>
    %c2 = arith.constant 2 : index
    %c0_5 = arith.constant 0 : index
    %4 = vector.load %arg8[%c2, %c0_5] : memref<6x32xf32, #tpu.memory_space<vmem>>, vector<1x32xf32>
    %c3 = arith.constant 3 : index
    %c0_6 = arith.constant 0 : index
    %5 = vector.load %arg8[%c3, %c0_6] : memref<6x32xf32, #tpu.memory_space<vmem>>, vector<1x32xf32>
    %c4 = arith.constant 4 : index
    %c0_7 = arith.constant 0 : index
    %6 = vector.load %arg8[%c4, %c0_7] : memref<6x32xf32, #tpu.memory_space<vmem>>, vector<1x32xf32>
    %c5 = arith.constant 5 : index
    %c0_8 = arith.constant 0 : index
    %7 = vector.load %arg8[%c5, %c0_8] : memref<6x32xf32, #tpu.memory_space<vmem>>, vector<1x32xf32>
    %8 = arith.truncf %1 : vector<16x32xf32> to vector<16x32xbf16>
    %c0_9 = arith.constant 0 : index
    %c0_10 = arith.constant 0 : index
    %9 = vector.load %arg2[%c0_9, %c0_10] : memref<32x96xbf16, #tpu.memory_space<vmem>>, vector<32x96xbf16>
    %cst = arith.constant dense<0.000000e+00> : vector<16x96xf32>
    %10 = tpu.matmul %8, %9, %cst {dimension_numbers = #tpu.dot_dimension_numbers<[1], [0], [0], [1], [0, 0, 1, 1], [], []>} : vector<16x32xbf16>, vector<32x96xbf16>, vector<16x96xf32> -> vector<16x96xf32>
    %c0_11 = arith.constant 0 : index
    %c0_12 = arith.constant 0 : index
    %11 = vector.load %arg6[%c0_11, %c0_12] : memref<1x96xf32, #tpu.memory_space<vmem>>, vector<1x96xf32>
    %12 = vector.broadcast %11 : vector<1x96xf32> to vector<16x96xf32>
    %13 = arith.addf %10, %12 : vector<16x96xf32>
    %14 = vector.extract_strided_slice %13 {offsets = [0, 0], sizes = [16, 32], strides = [1, 1]} : vector<16x96xf32> to vector<16x32xf32>
    %cst_13 = arith.constant 0.176776692 : f32
    %15 = vector.broadcast %cst_13 : f32 to vector<16x32xf32>
    %16 = arith.mulf %14, %15 : vector<16x32xf32>
    %17 = arith.truncf %16 : vector<16x32xf32> to vector<16x32xbf16>
    %18 = vector.shape_cast %17 : vector<16x32xbf16> to vector<2x8x32xbf16>
    %19 = vector.extract_strided_slice %13 {offsets = [0, 32], sizes = [16, 32], strides = [1, 1]} : vector<16x96xf32> to vector<16x32xf32>
    %20 = arith.truncf %19 : vector<16x32xf32> to vector<16x32xbf16>
    %21 = vector.shape_cast %20 : vector<16x32xbf16> to vector<2x8x32xbf16>
    %22 = vector.extract_strided_slice %13 {offsets = [0, 64], sizes = [16, 32], strides = [1, 1]} : vector<16x96xf32> to vector<16x32xf32>
    %23 = arith.truncf %22 : vector<16x32xf32> to vector<16x32xbf16>
    %24 = vector.shape_cast %23 : vector<16x32xbf16> to vector<2x8x32xbf16>
    "tpu.trace_start"() <{level = 10 : i32, message = "bld,bmd->blm"}> : () -> ()
    %cst_14 = arith.constant dense<0.000000e+00> : vector<2x8x8xf32>
    %25 = tpu.matmul %18, %21, %cst_14 {dimension_numbers = #tpu.dot_dimension_numbers<[2], [2], [1], [1], [0, 0, 0, 1, 1, 1], [0], [0]>} : vector<2x8x32xbf16>, vector<2x8x32xbf16>, vector<2x8x8xf32> -> vector<2x8x8xf32>
    "tpu.trace_stop"() : () -> ()
    %cst_15 = arith.constant dense<0xFF800000> : vector<2x8xf32>
    %26 = vector.multi_reduction <maximumf>, %25, %cst_15 [2] : vector<2x8x8xf32> to vector<2x8xf32>
    %27 = vector.shape_cast %26 : vector<2x8xf32> to vector<2x8x1xf32>
    %28 = vector.broadcast %27 : vector<2x8x1xf32> to vector<2x8x8xf32>
    %29 = arith.subf %25, %28 : vector<2x8x8xf32>
    %30 = math.exp %29 : vector<2x8x8xf32>
    %cst_16 = arith.constant dense<0.000000e+00> : vector<2x8xf32>
    %31 = vector.multi_reduction <add>, %30, %cst_16 [2] : vector<2x8x8xf32> to vector<2x8xf32>
    %32 = vector.shape_cast %31 : vector<2x8xf32> to vector<2x8x1xf32>
    %33 = arith.truncf %30 : vector<2x8x8xf32> to vector<2x8x8xbf16>
    "tpu.trace_start"() <{level = 10 : i32, message = "blm,bmd->bld"}> : () -> ()
    %cst_17 = arith.constant dense<0.000000e+00> : vector<2x8x32xf32>
    %34 = tpu.matmul %33, %24, %cst_17 {dimension_numbers = #tpu.dot_dimension_numbers<[2], [1], [1], [2], [0, 0, 0, 1, 1, 2], [0], [0]>} : vector<2x8x8xbf16>, vector<2x8x32xbf16>, vector<2x8x32xf32> -> vector<2x8x32xf32>
    "tpu.trace_stop"() : () -> ()
    %35 = tpu.reciprocal %32 {approx = true} : vector<2x8x1xf32> -> vector<2x8x1xf32>
    %36 = vector.broadcast %35 : vector<2x8x1xf32> to vector<2x8x32xf32>
    %37 = arith.mulf %34, %36 : vector<2x8x32xf32>
    %38 = vector.shape_cast %37 : vector<2x8x32xf32> to vector<16x32xf32>
    %39 = arith.truncf %38 : vector<16x32xf32> to vector<16x32xbf16>
    %c0_18 = arith.constant 0 : index
    %c0_19 = arith.constant 0 : index
    %40 = vector.load %arg3[%c0_18, %c0_19] : memref<32x32xbf16, #tpu.memory_space<vmem>>, vector<32x32xbf16>
    %cst_20 = arith.constant dense<0.000000e+00> : vector<16x32xf32>
    %41 = tpu.matmul %39, %40, %cst_20 {dimension_numbers = #tpu.dot_dimension_numbers<[1], [0], [0], [1], [0, 0, 1, 1], [], []>} : vector<16x32xbf16>, vector<32x32xbf16>, vector<16x32xf32> -> vector<16x32xf32>
    %42 = vector.broadcast %2 : vector<1x32xf32> to vector<16x32xf32>
    %43 = arith.addf %41, %42 : vector<16x32xf32>
    %44 = arith.addf %1, %43 : vector<16x32xf32>
    %cst_21 = arith.constant dense<0.000000e+00> : vector<16xf32>
    %45 = vector.multi_reduction <add>, %44, %cst_21 [1] : vector<16x32xf32> to vector<16xf32>
    %46 = vector.shape_cast %45 : vector<16xf32> to vector<16x1xf32>
    %cst_22 = arith.constant 3.200000e+01 : f32
    %47 = vector.broadcast %cst_22 : f32 to vector<16x1xf32>
    %48 = arith.divf %46, %47 : vector<16x1xf32>
    %49 = vector.broadcast %48 : vector<16x1xf32> to vector<16x32xf32>
    %50 = arith.subf %44, %49 : vector<16x32xf32>
    %51 = arith.mulf %50, %50 : vector<16x32xf32>
    %cst_23 = arith.constant dense<0.000000e+00> : vector<16xf32>
    %52 = vector.multi_reduction <add>, %51, %cst_23 [1] : vector<16x32xf32> to vector<16xf32>
    %53 = vector.shape_cast %52 : vector<16xf32> to vector<16x1xf32>
    %cst_24 = arith.constant 3.200000e+01 : f32
    %54 = vector.broadcast %cst_24 : f32 to vector<16x1xf32>
    %55 = arith.divf %53, %54 : vector<16x1xf32>
    %56 = vector.broadcast %48 : vector<16x1xf32> to vector<16x32xf32>
    %57 = arith.subf %44, %56 : vector<16x32xf32>
    %cst_25 = arith.constant 9.99999974E-6 : f32
    %58 = vector.broadcast %cst_25 : f32 to vector<16x1xf32>
    %59 = arith.addf %55, %58 : vector<16x1xf32>
    %60 = math.rsqrt %59 : vector<16x1xf32>
    %61 = vector.broadcast %60 : vector<16x1xf32> to vector<16x32xf32>
    %62 = arith.mulf %57, %61 : vector<16x32xf32>
    %63 = vector.broadcast %4 : vector<1x32xf32> to vector<16x32xf32>
    %64 = arith.mulf %62, %63 : vector<16x32xf32>
    %65 = vector.broadcast %5 : vector<1x32xf32> to vector<16x32xf32>
    %66 = arith.addf %64, %65 : vector<16x32xf32>
    %67 = arith.truncf %66 : vector<16x32xf32> to vector<16x32xbf16>
    %c0_26 = arith.constant 0 : index
    %c0_27 = arith.constant 0 : index
    %68 = vector.load %arg4[%c0_26, %c0_27] : memref<32x128xbf16, #tpu.memory_space<vmem>>, vector<32x128xbf16>
    %cst_28 = arith.constant dense<0.000000e+00> : vector<16x128xf32>
    %69 = tpu.matmul %67, %68, %cst_28 {dimension_numbers = #tpu.dot_dimension_numbers<[1], [0], [0], [1], [0, 0, 1, 1], [], []>} : vector<16x32xbf16>, vector<32x128xbf16>, vector<16x128xf32> -> vector<16x128xf32>
    %c0_29 = arith.constant 0 : index
    %c0_30 = arith.constant 0 : index
    %70 = vector.load %arg7[%c0_29, %c0_30] : memref<1x128xf32, #tpu.memory_space<vmem>>, vector<1x128xf32>
    %71 = vector.broadcast %70 : vector<1x128xf32> to vector<16x128xf32>
    %72 = arith.addf %69, %71 : vector<16x128xf32>
    %cst_31 = arith.constant 0.000000e+00 : f32
    %73 = vector.broadcast %cst_31 : f32 to vector<16x128xf32>
    %74 = arith.maximumf %72, %73 : vector<16x128xf32>
    %75 = arith.truncf %74 : vector<16x128xf32> to vector<16x128xbf16>
    %c0_32 = arith.constant 0 : index
    %c0_33 = arith.constant 0 : index
    %76 = vector.load %arg5[%c0_32, %c0_33] : memref<128x32xbf16, #tpu.memory_space<vmem>>, vector<128x32xbf16>
    %cst_34 = arith.constant dense<0.000000e+00> : vector<16x32xf32>
    %77 = tpu.matmul %75, %76, %cst_34 {dimension_numbers = #tpu.dot_dimension_numbers<[1], [0], [0], [1], [0, 0, 1, 1], [], []>} : vector<16x128xbf16>, vector<128x32xbf16>, vector<16x32xf32> -> vector<16x32xf32>
    %78 = vector.broadcast %3 : vector<1x32xf32> to vector<16x32xf32>
    %79 = arith.addf %77, %78 : vector<16x32xf32>
    %80 = arith.addf %66, %79 : vector<16x32xf32>
    %cst_35 = arith.constant dense<0.000000e+00> : vector<16xf32>
    %81 = vector.multi_reduction <add>, %80, %cst_35 [1] : vector<16x32xf32> to vector<16xf32>
    %82 = vector.shape_cast %81 : vector<16xf32> to vector<16x1xf32>
    %cst_36 = arith.constant 3.200000e+01 : f32
    %83 = vector.broadcast %cst_36 : f32 to vector<16x1xf32>
    %84 = arith.divf %82, %83 : vector<16x1xf32>
    %85 = vector.broadcast %84 : vector<16x1xf32> to vector<16x32xf32>
    %86 = arith.subf %80, %85 : vector<16x32xf32>
    %87 = arith.mulf %86, %86 : vector<16x32xf32>
    %cst_37 = arith.constant dense<0.000000e+00> : vector<16xf32>
    %88 = vector.multi_reduction <add>, %87, %cst_37 [1] : vector<16x32xf32> to vector<16xf32>
    %89 = vector.shape_cast %88 : vector<16xf32> to vector<16x1xf32>
    %cst_38 = arith.constant 3.200000e+01 : f32
    %90 = vector.broadcast %cst_38 : f32 to vector<16x1xf32>
    %91 = arith.divf %89, %90 : vector<16x1xf32>
    %92 = vector.broadcast %84 : vector<16x1xf32> to vector<16x32xf32>
    %93 = arith.subf %80, %92 : vector<16x32xf32>
    %cst_39 = arith.constant 9.99999974E-6 : f32
    %94 = vector.broadcast %cst_39 : f32 to vector<16x1xf32>
    %95 = arith.addf %91, %94 : vector<16x1xf32>
    %96 = math.rsqrt %95 : vector<16x1xf32>
    %97 = vector.broadcast %96 : vector<16x1xf32> to vector<16x32xf32>
    %98 = arith.mulf %93, %97 : vector<16x32xf32>
    %99 = vector.broadcast %6 : vector<1x32xf32> to vector<16x32xf32>
    %100 = arith.mulf %98, %99 : vector<16x32xf32>
    %101 = vector.broadcast %7 : vector<1x32xf32> to vector<16x32xf32>
    %102 = arith.addf %100, %101 : vector<16x32xf32>
    %103 = vector.shape_cast %102 : vector<16x32xf32> to vector<2x8x32xf32>
    %c0_40 = arith.constant 0 : index
    %c0_41 = arith.constant 0 : index
    %c0_42 = arith.constant 0 : index
    %104 = vector.load %arg9[%c0_40, %c0_41, %c0_42] : memref<2x8x32xf32, #tpu.memory_space<vmem>>, vector<2x8x32xf32>
    tpu.vector_store %arg9[%c0_40, %c0_41, %c0_42], %103 {strides = array<i32>} : memref<2x8x32xf32, #tpu.memory_space<vmem>>, vector<2x8x32xf32>,
    return
  }
  func.func @transform_0(%arg0: i32) -> (i32, i32, i32) {
    %c0_i32 = arith.constant 0 : i32
    %c0_i32_0 = arith.constant 0 : i32
    %c0_i32_1 = arith.constant 0 : i32
    return %arg0, %c0_i32, %c0_i32_0 : i32, i32, i32
  }
  func.func @transform_1(%arg0: i32) -> (i32, i32) {
    %c0_i32 = arith.constant 0 : i32
    %c0_i32_0 = arith.constant 0 : i32
    %c0_i32_1 = arith.constant 0 : i32
    return %c0_i32, %c0_i32_0 : i32, i32
  }
  func.func @transform_2(%arg0: i32) -> (i32, i32) {
    %c0_i32 = arith.constant 0 : i32
    %c0_i32_0 = arith.constant 0 : i32
    %c0_i32_1 = arith.constant 0 : i32
    return %c0_i32, %c0_i32_0 : i32, i32
  }
  func.func @transform_3(%arg0: i32) -> (i32, i32) {
    %c0_i32 = arith.constant 0 : i32
    %c0_i32_0 = arith.constant 0 : i32
    %c0_i32_1 = arith.constant 0 : i32
    return %c0_i32, %c0_i32_0 : i32, i32
  }
  func.func @transform_4(%arg0: i32) -> (i32, i32) {
    %c0_i32 = arith.constant 0 : i32
    %c0_i32_0 = arith.constant 0 : i32
    %c0_i32_1 = arith.constant 0 : i32
    return %c0_i32, %c0_i32_0 : i32, i32
  }
  func.func @transform_5(%arg0: i32) -> (i32, i32) {
    %c0_i32 = arith.constant 0 : i32
    %c0_i32_0 = arith.constant 0 : i32
    %c0_i32_1 = arith.constant 0 : i32
    return %c0_i32, %c0_i32_0 : i32, i32
  }
  func.func @transform_6(%arg0: i32) -> (i32, i32) {
    %c0_i32 = arith.constant 0 : i32
    %c0_i32_0 = arith.constant 0 : i32
    %c0_i32_1 = arith.constant 0 : i32
    return %c0_i32, %c0_i32_0 : i32, i32
  }
  func.func @transform_7(%arg0: i32) -> (i32, i32) {
    %c0_i32 = arith.constant 0 : i32
    %c0_i32_0 = arith.constant 0 : i32
    %c0_i32_1 = arith.constant 0 : i32
    return %c0_i32, %c0_i32_0 : i32, i32
  }
  func.func @transform_8(%arg0: i32) -> (i32, i32, i32) {
    %c0_i32 = arith.constant 0 : i32
    %c0_i32_0 = arith.constant 0 : i32
    %c0_i32_1 = arith.constant 0 : i32
    return %arg0, %c0_i32, %c0_i32_0 : i32, i32, i32
  }
}

</mosaic_0001>

<bundles_post_ra>
// kernel: tpu_custom_call.1
= control target key start
LH: loop header
LB: loop body
LE: loop exit
PB: predicated region body
PF: predicated region fallthrough
CT: control target
= control target key end

     0   :  { %v876_v1 = vmov 0.0   ;;  %vm877_vm0 = vmmov 0   ;;  %vm63_vm1 = vcmask 261120   ;;  %s1081_s0 = inlined_call_operand.vmem [shape: f32[2,8,32], index: 0, kind: input, shape index: {}]   ;;  %s1082_s1 = inlined_call_operand.vmem [shape: bf16[32,96], index: 1, kind: input, shape index: {}]   ;;  %s1083_s2 = inlined_call_operand.vmem [shape: bf16[32,32], index: 2, kind: input, shape index: {}]   ;;  %s1084_s3 = inlined_call_operand.vmem [shape: bf16[32,128], index: 3, kind: input, shape index: {}]   ;;  %s1085_s4 = inlined_call_operand.vmem [shape: bf16[128,32], index: 4, kind: input, shape index: {}]   ;;  %s1086_s5 = inlined_call_operand.vmem [shape: f32[1,96], index: 5, kind: input, shape index: {}]   ;;  %s1087_s6 = inlined_call_operand.vmem [shape: f32[1,128], index: 6, kind: input, shape index: {}]   ;;  %s1088_s7 = inlined_call_operand.vmem [shape: f32[6,32], index: 7, kind: input, shape index: {}]   ;;  %s1089_s8 = inlined_call_operand.hbm [shape: f32[2,8,32], index: 8, kind: output, shape index: {}]  }
   0x1   :  { %v822_v0 = vld [vmem:[%s1082_s1] sm:$0xff]   ;;  %747 = vmatprep.subr.bf16.mxu0 %v876_v1  ;;  %767 = vmatprep.subr.bf16.mxu1 %v876_v1  ;;  %v823_v2 = vld [vmem:[%s1082_s1 + $0x8] sm:$0xff]  }
   0x2   :  { %748 = vmatpush3.bf16.msra.mxu0 %v822_v0  ;;  %751 = vmatprep.mubr.msk.bf16.mxu0 %vm877_vm0, %v876_v1  ;;  %v941_v3 = vld [vmem:[%s1081_s0] sm:$0xff]  ;;  %v946_v4 = vld [vmem:[%s1081_s0 + $0x8] sm:$0xff] }
   0x3   :  { %749 = vmatprep.subr.bf16.mxu0 %v876_v1  ;;  %769 = vmatprep.mubr.msk.bf16.mxu1 %vm877_vm0, %v876_v1  ;;  %v39_v5 = vpack.c.bf16 %v946_v4, %v941_v3 }
   0x6   :  { %750 = vmatpush3.bf16.msra.mxu0 %v823_v2 }
   0x7   :  { %755 = vmatprep.subr.bf16.mxu0 %v876_v1 }
   0x9   :  { %752 = vmatmul.mubr.msk.bf16.vlgmr.msra.gmra.mrb[0].mxu0 %vm63_vm1, %v39_v5 }
   0xa   :  { %757 = vmatprep.mubr.msk.bf16.mxu0 %vm877_vm0, %v876_v1 }
   0xb   :  { %13 = vsyncpa [#allocation3], 0  ;;  %v684_v6 = vld [vmem:[%s1086_s5] ss:$0 sm:$0xff]  ;;  %s878_s13 = smov 96   ;;  %s879_s14 = smov 64  }
   0xc   :  { %vm244_vm2 = vcmask 1043456   ;;  %vm218_vm3 = vcmask 64512   ;;  %v824_v49 = vld [vmem:[%s1083_s2] sm:$0xff]   ;;  %v825_v50 = vld [vmem:[%s1083_s2 + $0x8] sm:$0xff]   ;;  %s880_s22 = smov [#allocation2]  }
   0xd   :  { %v696_v5 = vld [vmem:[%s1088_s7] ss:$0 sm:$0xff]  ;;  %s673_s23 = sshll.u32 %s880_s22, 4  ;;  %s674_s23 = int_to_ptr.vmem [resolvable:$true] %s673_s23 }
   0xe   :  { %s852_s24 = scalar_lea.vmem %s674_s23, 256  ;;  %p857_p1 = scmp.lt.s32.totalorder %s674_s23, %s674_s23 }
   0xf   :  { %p853_p0 = scmp.ne.s32.totalorder %s674_s23, %s852_s24  ;;  %p858_p2 = scmp.lt.s32.totalorder %s852_s24, %s852_s24 }
  0x11   :  { %p859_p3 = por %p858_p2, %p857_p1 }
  0x13   :  { %p860_p4 = pnand %p859_p3, %p853_p0 }
  0xdc   :  { %v101_v7 = vpop.f32.mrb[0].mxu0 }
  0xdd   :  { %v102_v8 = vadd.f32 %v684_v6, %v101_v7  ;;  %v753_v9 = vpop.f32.mrb[1].mxu0 }
  0xde   :  { %v104_v10 = vpop.f32.mrb[2].mxu0 }
  0xdf   :  { %v105_v11 = vadd.f32 %v684_v6, %v104_v10  ;;  %v754_v12 = vpop.f32.mrb[3].mxu0  ;;  %v719_v13 = vpack.c.bf16 %v102_v8, %v102_v8  ;;  %v108_v17 = vmul.f32 0.17677669, %v102_v8 }
  0xe1   :  { %121 = vrot.lane.b32.xlu0 %v719_v13, %s878_s13  ;;  %v720_v14 = vpack.c.bf16 %v105_v11, %v105_v11  ;;  %v717_v19 = vpack.c.bf16 %v108_v17, %v108_v17  ;;  %v109_v23 = vmul.f32 0.17677669, %v105_v11 }
  0xe3   :  { %v718_v24 = vpack.c.bf16 %v109_v23, %v109_v23 }
  0xe5   :  { %170 = vrot.lane.b32.xlu0 %v720_v14, %s878_s13 }
  0xe9   :  { %239 = vrot.lane.b32.xlu0 %v719_v13, %s879_s14 }
 0x153   :  { %v122_v15 = vpop.permute.xlu0 %121 }
 0x154   :  { %v127_v16 = vsel %vm63_vm1, %v122_v15, 0 }
 0x155   :  { %756 = vmatpush3.bf16.xpose.msra.mxu0 %v127_v16 }
 0x156   :  { %761 = vmatprep.subr.bf16.mxu0 %v876_v1 }
 0x157   :  { %v171_v18 = vpop.permute.xlu0 %170 }
 0x158   :  { %v176_v21 = vsel %vm63_vm1, %v171_v18, 0 }
 0x15b   :  { %v240_v20 = vpop.permute.xlu0 %239 }
 0x15c   :  { %758 = vmatmul.mubr.msk.bf16.vlgmr.msra.gmra.mrb[4].mxu0 %vm63_vm1, %v717_v19  ;;  %v246_v22 = vsel %vm244_vm2, %v240_v20, 0 }
 0x15d   :  { %762 = vmatpush3.bf16.xpose.msra.mxu0 %v176_v21  ;;  %768 = vmatpush3.bf16.msra.mxu1 %v246_v22 }
 0x15e   :  { %763 = vmatprep.mubr.msk.bf16.mxu0 %vm877_vm0, %v876_v1  ;;  %773 = vmatprep.subr.bf16.mxu0 %v876_v1 }
 0x15f   :  { %779 = vmatprep.subr.bf16.mxu1 %v876_v1 }
 0x164   :  { %764 = vmatmul.mubr.msk.bf16.vlgmr.msra.gmra.mrb[8].mxu0 %vm63_vm1, %v718_v24 }
 0x165   :  { %775 = vmatprep.mubr.msk.bf16.mxu0 %vm877_vm0, %v876_v1 }
 0x22f   :  { %v163_v25 = vpop.f32.mrb[4].mxu0 }
 0x230   :  { %v759_v26 = vpop.f32.mrb[5].mxu0  ;;  %v219_v27 = vsel %vm218_vm3, %v163_v25, -inf }
 0x231   :  { %220 = vmax.xlane.f32.xlu1 %v219_v27  ;;  %v166_v28 = vpop.f32.mrb[6].mxu0  ;;  %v828_v26 = vld [vmem:[%s1085_s4] sm:$0xff]   ;;  %v829_v27 = vld [vmem:[%s1085_s4 + $0x8] sm:$0xff]  }
 0x232   :  { %v760_v29 = vpop.f32.mrb[7].mxu0  ;;  %v830_v28 = vld [vmem:[%s1085_s4 + $0x10] sm:$0xff]  }
 0x233   :  { %v831_v29 = vld [vmem:[%s1085_s4 + $0x18] sm:$0xff]  }
 0x237   :  { %v212_v30 = vpop.f32.mrb[8].mxu0 }
 0x238   :  { %v765_v31 = vpop.f32.mrb[9].mxu0  ;;  %v222_v32 = vsel %vm218_vm3, %v212_v30, -inf }
 0x239   :  { %223 = vmax.xlane.f32.xlu1 %v222_v32  ;;  %v215_v33 = vpop.f32.mrb[10].mxu0  ;;  %v833_v31 = vld [vmem:[%s1085_s4 + $0x28] sm:$0xff]  }
 0x23a   :  { %v766_v34 = vpop.f32.mrb[11].mxu0 }
 0x24a   :  { %288 = vrot.lane.b32.xlu1 %v720_v14, %s879_s14 }
 0x2be   :  { %v221_v35 = vpop.xlane.xlu1 %220 }
 0x2bf   :  { %v225_v36 = vsub.f32 %v163_v25, %v221_v35  ;;  %v827_v25 = vld [vmem:[%s1084_s3 + $0x8] sm:$0xff]  }
 0x2c1   :  { %v227_v37 = vmul.f32 1.442695, %v225_v36 }
 0x2c3   :  { %836 = vpow2.f32 %v227_v37 }
 0x2c6   :  { %v224_v38 = vpop.xlane.xlu1 %223 }
 0x2c7   :  { %v226_v39 = vsub.f32 %v212_v30, %v224_v38  ;;  %v832_v30 = vld [vmem:[%s1085_s4 + $0x20] sm:$0xff]  }
 0x2c9   :  { %v229_v40 = vmul.f32 1.442695, %v226_v39 }
 0x2ca   :  { %v289_v41 = vpop.permute.xlu1 %288 }
 0x2cb   :  { %838 = vpow2.f32 %v229_v40  ;;  %v294_v42 = vsel %vm244_vm2, %v289_v41, 0  ;;  %v700_v40 = vld [vmem:[%s1088_s7 + $0x2] ss:$0 sm:$0xff] }
 0x2cc   :  { %774 = vmatpush3.bf16.msra.mxu0 %v294_v42 }
 0x2cd   :  { %v837_v43 = vpop.eup %836  ;;  %787 = vmatprep.subr.bf16.mxu0 %v876_v1 }
 0x2ce   :  { %v231_v44 = vsel %vm218_vm3, %v837_v43, 0.0  ;;  %v237_v45 = vpack.c.bf16 %v837_v43, %v837_v43 }
 0x2cf   :  { %232 = vadd.xlane.f32.xlu0 %v231_v44  ;;  %v701_v44 = vld [vmem:[%s1088_s7 + $0x3] ss:$0 sm:$0xff] }
 0x2d0   :  { %770 = vmatmul.mubr.msk.bf16.vlgmr.msra.gmra.mrb[0].mxu1 %vm218_vm3, %v237_v45 }
 0x2d1   :  { %783 = vmatprep.mubr.msk.bf16.mxu1 %vm877_vm0, %v876_v1  ;;  %780 = vmatpush3.bf16.msra.mxu1 %v824_v49  ;;  %v834_v49 = vld [vmem:[%s1085_s4 + $0x30] sm:$0xff]  }
 0x2d2   :  { %781 = vmatprep.subr.bf16.mxu1 %v876_v1 }
 0x2d5   :  { %v839_v46 = vpop.eup %838  ;;  %782 = vmatpush3.bf16.msra.mxu1 %v825_v50  ;;  %v835_v50 = vld [vmem:[%s1085_s4 + $0x38] sm:$0xff]  }
 0x2d6   :  { %v234_v47 = vsel %vm218_vm3, %v839_v46, 0.0  ;;  %v238_v48 = vpack.c.bf16 %v839_v46, %v839_v46  ;;  %795 = vmatprep.subr.bf16.mxu1 %v876_v1 }
 0x2d7   :  { %235 = vadd.xlane.f32.xlu1 %v234_v47 }
 0x2d8   :  { %776 = vmatmul.mubr.msk.bf16.vlgmr.msra.gmra.mrb[12].mxu0 %vm218_vm3, %v238_v48 }
 0x2d9   :  { %791 = vmatprep.mubr.msk.bf16.mxu0 %vm877_vm0, %v876_v1 }
 0x35c   :  { %v233_v51 = vpop.xlane.xlu0 %232 }
 0x35d   :  { %840 = vrcp.f32 %v233_v51  ;;  %v702_v51 = vld [vmem:[%s1087_s6] ss:$0 sm:$0xff] }
 0x364   :  { %v236_v52 = vpop.xlane.xlu1 %235 }
 0x365   :  { %842 = vrcp.f32 %v236_v52 }
 0x367   :  { %v841_v57 = vpop.eup %840 }
 0x36f   :  { %v843_v58 = vpop.eup %842 }
 0x3a3   :  { %v282_v53 = vpop.f32.mrb[0].mxu1 }
 0x3a4   :  { %v771_v54 = vpop.f32.mrb[1].mxu1  ;;  %v338_v60 = vmul.f32 %v841_v57, %v282_v53 }
 0x3a5   :  { %v285_v55 = vpop.f32.mrb[2].mxu1 }
 0x3a6   :  { %v772_v56 = vpop.f32.mrb[3].mxu1 }
 0x3ab   :  { %v330_v59 = vpop.f32.mrb[12].mxu0 }
 0x3ac   :  { %v339_v61 = vmul.f32 %v843_v58, %v330_v59  ;;  %v777_v62 = vpop.f32.mrb[13].mxu0 }
 0x3ad   :  { %v333_v63 = vpop.f32.mrb[14].mxu0 }
 0x3ae   :  { %v340_v0 = vpack.c.bf16 %v339_v61, %v338_v60  ;;  %v778_v2 = vpop.f32.mrb[15].mxu0 }
 0x3b0   :  { %784 = vmatmul.mubr.msk.bf16.vlgmr.msra.gmra.mrb[4].mxu1 %vm63_vm1, %v340_v0 }
 0x3b1   :  { %811 = vmatprep.mubr.msk.bf16.mxu1 %vm877_vm0, %v876_v1  ;;  %796 = vmatpush3.bf16.msra.mxu1 %v828_v26 }
 0x3b2   :  { %797 = vmatprep.subr.bf16.mxu1 %v876_v1 }
 0x3b5   :  { %798 = vmatpush3.bf16.msra.mxu1 %v829_v27 }
 0x3b6   :  { %799 = vmatprep.subr.bf16.mxu1 %v876_v1 }
 0x3b9   :  { %800 = vmatpush3.bf16.msra.mxu1 %v830_v28  ;;  %v716_v28 = vld [vmem:[%s1088_s7 + $0x5] ss:$0 sm:$0xff] }
 0x3ba   :  { %801 = vmatprep.subr.bf16.mxu1 %v876_v1 }
 0x3bd   :  { %802 = vmatpush3.bf16.msra.mxu1 %v831_v29 }
 0x3be   :  { %803 = vmatprep.subr.bf16.mxu1 %v876_v1 }
 0x3c1   :  { %804 = vmatpush3.bf16.msra.mxu1 %v832_v30 }
 0x3c2   :  { %805 = vmatprep.subr.bf16.mxu1 %v876_v1 }
 0x3c5   :  { %806 = vmatpush3.bf16.msra.mxu1 %v833_v31 }
 0x3c6   :  { %807 = vmatprep.subr.bf16.mxu1 %v876_v1 }
 0x3c9   :  { %808 = vmatpush3.bf16.msra.mxu1 %v834_v49 }
 0x3ca   :  { %809 = vmatprep.subr.bf16.mxu1 %v876_v1 }
 0x3cd   :  { %810 = vmatpush3.bf16.msra.mxu1 %v835_v50 }
 0x483   :  { %v398_v6 = vpop.f32.mrb[4].mxu1 }
 0x484   :  { %v399_v7 = vadd.f32 %v696_v5, %v398_v6  ;;  %v785_v8 = vpop.f32.mrb[5].mxu1 }
 0x485   :  { %v401_v9 = vpop.f32.mrb[6].mxu1 }
 0x486   :  { %v402_v10 = vadd.f32 %v696_v5, %v401_v9  ;;  %v786_v11 = vpop.f32.mrb[7].mxu1  ;;  %v405_v12 = vadd.f32 %v399_v7, %v941_v3 }
 0x488   :  { %v407_v13 = vsel %vm63_vm1, %v405_v12, 0.0  ;;  %v406_v14 = vadd.f32 %v402_v10, %v946_v4  ;;  %v826_v4 = vld [vmem:[%s1084_s3] sm:$0xff]  }
 0x489   :  { %408 = vadd.xlane.f32.xlu0 %v407_v13  ;;  %788 = vmatpush3.bf16.msra.mxu0 %v826_v4 }
 0x48a   :  { %v410_v15 = vsel %vm63_vm1, %v406_v14, 0.0  ;;  %789 = vmatprep.subr.bf16.mxu0 %v876_v1  ;;  %v706_v1 = vld [vmem:[%s1088_s7 + $0x1] ss:$0 sm:$0xff] }
 0x48d   :  { %411 = vadd.xlane.f32.xlu0 %v410_v15  ;;  %790 = vmatpush3.bf16.msra.mxu0 %v827_v25  ;;  %v715_v25 = vld [vmem:[%s1088_s7 + $0x4] ss:$0 sm:$0xff] }
 0x516   :  { %v409_v16 = vpop.xlane.xlu0 %408 }
 0x517   :  { %v414_v17 = vmul.f32 0.03125, %v409_v16 }
 0x519   :  { %v416_v18 = vsub.f32 %v405_v12, %v414_v17 }
 0x51a   :  { %v412_v19 = vpop.xlane.xlu0 %411 }
 0x51b   :  { %v415_v20 = vmul.f32 0.03125, %v412_v19  ;;  %v418_v21 = vmul.f32 %v416_v18, %v416_v18 }
 0x51d   :  { %v417_v22 = vsub.f32 %v406_v14, %v415_v20  ;;  %v420_v23 = vsel %vm63_vm1, %v418_v21, 0.0 }
 0x51e   :  { %421 = vadd.xlane.f32.xlu0 %v420_v23 }
 0x51f   :  { %v419_v24 = vmul.f32 %v417_v22, %v417_v22 }
 0x521   :  { %v423_v3 = vsel %vm63_vm1, %v419_v24, 0.0 }
 0x522   :  { %424 = vadd.xlane.f32.xlu0 %v423_v3 }
 0x5ab   :  { %v422_v32 = vpop.xlane.xlu0 %421 }
 0x5ac   :  { %v426_v33 = vmul.f32 0.03125, %v422_v32 }
 0x5ae   :  { %v428_v34 = vadd.f32 1e-05, %v426_v33 }
 0x5af   :  { %v425_v35 = vpop.xlane.xlu0 %424 }
 0x5b0   :  { %844 = vrsqrt.f32 %v428_v34  ;;  %v427_v36 = vmul.f32 0.03125, %v425_v35 }
 0x5b2   :  { %v429_v37 = vadd.f32 1e-05, %v427_v36 }
 0x5b4   :  { %846 = vrsqrt.f32 %v429_v37 }
 0x5ba   :  { %v845_v38 = vpop.eup %844 }
 0x5bb   :  { %v432_v39 = vmul.f32 %v845_v38, %v416_v18 }
 0x5bd   :  { %v438_v42 = vmul.f32 %v700_v40, %v432_v39 }
 0x5be   :  { %v847_v41 = vpop.eup %846 }
 0x5bf   :  { %v433_v43 = vmul.f32 %v847_v41, %v417_v22  ;;  %v444_v46 = vadd.f32 %v701_v44, %v438_v42 }
 0x5c1   :  { %v439_v45 = vmul.f32 %v700_v40, %v433_v43 }
 0x5c3   :  { %v445_v47 = vadd.f32 %v701_v44, %v439_v45 }
 0x5c5   :  { %v446_v48 = vpack.c.bf16 %v445_v47, %v444_v46 }
 0x5c7   :  { %792 = vmatmul.mubr.msk.bf16.vlgmr.msra.gmra.mrb[16].mxu0 %vm63_vm1, %v446_v48 }
 0x69a   :  { %v507_v52 = vpop.f32.mrb[16].mxu0 }
 0x69b   :  { %v508_v53 = vadd.f32 %v702_v51, %v507_v52  ;;  %v793_v54 = vpop.f32.mrb[17].mxu0 }
 0x69c   :  { %v510_v55 = vpop.f32.mrb[18].mxu0 }
 0x69d   :  { %v511_v56 = vadd.f32 %v702_v51, %v510_v55  ;;  %v794_v57 = vpop.f32.mrb[19].mxu0  ;;  %v514_v58 = vmax.f32 %v508_v53, 0.0 }
 0x69f   :  { %v515_v59 = vmax.f32 %v511_v56, 0.0 }
 0x6a1   :  { %v516_v60 = vpack.c.bf16 %v515_v59, %v514_v58 }
 0x6a3   :  { %812 = vmatmul.mubr.bf16.vlgmr.msra.gmra.mrb[8].mxu1 %v516_v60 }
 0x776   :  { %v619_v61 = vpop.f32.mrb[8].mxu1 }
 0x777   :  { %v620_v62 = vadd.f32 %v706_v1, %v619_v61  ;;  %v813_v63 = vpop.f32.mrb[9].mxu1 }
 0x778   :  { %v622_v0 = vpop.f32.mrb[10].mxu1 }
 0x779   :  { %v623_v2 = vadd.f32 %v706_v1, %v622_v0  ;;  %v814_v5 = vpop.f32.mrb[11].mxu1  ;;  %v626_v6 = vadd.f32 %v620_v62, %v444_v46 }
 0x77b   :  { %v628_v7 = vsel %vm63_vm1, %v626_v6, 0.0  ;;  %v627_v8 = vadd.f32 %v623_v2, %v445_v47 }
 0x77c   :  { %629 = vadd.xlane.f32.xlu0 %v628_v7 }
 0x77d   :  { %v631_v9 = vsel %vm63_vm1, %v627_v8, 0.0 }
 0x77e   :  { %632 = vadd.xlane.f32.xlu1 %v631_v9 }
 0x809   :  { %v630_v10 = vpop.xlane.xlu0 %629 }
 0x80a   :  { %v634_v11 = vmul.f32 0.03125, %v630_v10 }
 0x80b   :  { %v633_v12 = vpop.xlane.xlu1 %632 }
 0x80c   :  { %v636_v13 = vsub.f32 %v626_v6, %v634_v11  ;;  %v635_v14 = vmul.f32 0.03125, %v633_v12 }
 0x80e   :  { %v637_v15 = vsub.f32 %v627_v8, %v635_v14  ;;  %v638_v16 = vmul.f32 %v636_v13, %v636_v13 }
 0x810   :  { %v640_v17 = vsel %vm63_vm1, %v638_v16, 0.0  ;;  %v639_v18 = vmul.f32 %v637_v15, %v637_v15 }
 0x811   :  { %641 = vadd.xlane.f32.xlu0 %v640_v17 }
 0x812   :  { %v643_v19 = vsel %vm63_vm1, %v639_v18, 0.0 }
 0x813   :  { %644 = vadd.xlane.f32.xlu1 %v643_v19 }
 0x89e   :  { %v642_v20 = vpop.xlane.xlu0 %641 }
 0x89f   :  { %v646_v21 = vmul.f32 0.03125, %v642_v20 }
 0x8a0   :  { %v645_v22 = vpop.xlane.xlu1 %644 }
 0x8a1   :  { %v648_v23 = vadd.f32 1e-05, %v646_v21  ;;  %v647_v24 = vmul.f32 0.03125, %v645_v22 }
 0x8a3   :  { %848 = vrsqrt.f32 %v648_v23  ;;  %v649_v3 = vadd.f32 1e-05, %v647_v24 }
 0x8a5   :  { %850 = vrsqrt.f32 %v649_v3 }
 0x8ad   :  { %v849_v4 = vpop.eup %848 }
 0x8ae   :  { %v652_v26 = vmul.f32 %v849_v4, %v636_v13 }
 0x8af   :  { %v851_v27 = vpop.eup %850 }
 0x8b0   :  { %v653_v29 = vmul.f32 %v851_v27, %v637_v15  ;;  %v658_v30 = vmul.f32 %v715_v25, %v652_v26 }
 0x8b2   :  { %v659_v31 = vmul.f32 %v715_v25, %v653_v29  ;;  %v664_v32 = vadd.f32 %v716_v28, %v658_v30 }
 0x8b4   :  { %v665_v33 = vadd.f32 %v716_v28, %v659_v31  ;;  %666 = vst.msk [vmem:[#allocation2] sm:$0xff] %vm63_vm1, %v664_v32 }
 0x8b6   :  { %667 = vst.msk [vmem:[#allocation2 + $0x8] sm:$0xff] %vm63_vm1, %v665_v33 }
 0x8b7   :  { %863 = shalt.err (!%p860_p4)
}
 0x8b8   :  { %s864_s26 = scalar_lea.hbm %s1089_s8, 256 }
 0x8b9   :  { %p865_p5 = scmp.ne.s32.totalorder %s1089_s8, %s864_s26  ;;  %p868_p6 = scmp.lt.u32.totalorder %s864_s26, %s1089_s8 }
 0x8bb   :  { %p870_p7 = pnand %p868_p6, %p865_p5 }
 0x8bd   :  { %873 = shalt.err (!%p870_p7)
}
 0x8be   :  { %s881_s30 = smov 128   ;;  %s882_s9 = smov 8  }
 0x8bf   :  { %679 = dma.vmem_to_hbm [thread:$0]  %s674_s23, 256, %s1089_s8, [#allocation3], %s881_s30, %s881_s30, %s882_s9  }
 0x8c0   :  { %874 = dma.done.wait [#allocation3], 256  }
 0x8c1   :  { %875 = vsyncadd [#allocation3], 4294967040 }
 0x8c2   :  { %683 = vsyncpa [#allocation3], 1 }

// kernel: tpu_custom_call.1
= control target key start
LH: loop header
LB: loop body
LE: loop exit
PB: predicated region body
PF: predicated region fallthrough
CT: control target
= control target key end

     0   :  { %v876_v1 = vmov 0.0   ;;  %vm877_vm0 = vmmov 0   ;;  %vm63_vm1 = vcmask 261120   ;;  %s1081_s0 = inlined_call_operand.vmem [shape: f32[2,8,32], index: 0, kind: input, shape index: {}]   ;;  %s1082_s1 = inlined_call_operand.vmem [shape: bf16[32,96], index: 1, kind: input, shape index: {}]   ;;  %s1083_s2 = inlined_call_operand.vmem [shape: bf16[32,32], index: 2, kind: input, shape index: {}]   ;;  %s1084_s3 = inlined_call_operand.vmem [shape: bf16[32,128], index: 3, kind: input, shape index: {}]   ;;  %s1085_s4 = inlined_call_operand.vmem [shape: bf16[128,32], index: 4, kind: input, shape index: {}]   ;;  %s1086_s5 = inlined_call_operand.vmem [shape: f32[1,96], index: 5, kind: input, shape index: {}]   ;;  %s1087_s6 = inlined_call_operand.vmem [shape: f32[1,128], index: 6, kind: input, shape index: {}]   ;;  %s1088_s7 = inlined_call_operand.vmem [shape: f32[6,32], index: 7, kind: input, shape index: {}]   ;;  %s1089_s8 = inlined_call_operand.hbm [shape: f32[2,8,32], index: 8, kind: output, shape index: {}]  }
   0x1   :  { %v822_v0 = vld [vmem:[%s1082_s1] sm:$0xff]   ;;  %747 = vmatprep.subr.bf16.mxu0 %v876_v1  ;;  %767 = vmatprep.subr.bf16.mxu1 %v876_v1  ;;  %v823_v2 = vld [vmem:[%s1082_s1 + $0x8] sm:$0xff]  }
   0x2   :  { %748 = vmatpush3.bf16.msra.mxu0 %v822_v0  ;;  %751 = vmatprep.mubr.msk.bf16.mxu0 %vm877_vm0, %v876_v1  ;;  %v941_v3 = vld [vmem:[%s1081_s0] sm:$0xff]  ;;  %v946_v4 = vld [vmem:[%s1081_s0 + $0x8] sm:$0xff] }
   0x3   :  { %749 = vmatprep.subr.bf16.mxu0 %v876_v1  ;;  %769 = vmatprep.mubr.msk.bf16.mxu1 %vm877_vm0, %v876_v1  ;;  %v39_v5 = vpack.c.bf16 %v946_v4, %v941_v3 }
   0x6   :  { %750 = vmatpush3.bf16.msra.mxu0 %v823_v2 }
   0x7   :  { %755 = vmatprep.subr.bf16.mxu0 %v876_v1 }
   0x9   :  { %752 = vmatmul.mubr.msk.bf16.vlgmr.msra.gmra.mrb[0].mxu0 %vm63_vm1, %v39_v5 }
   0xa   :  { %757 = vmatprep.mubr.msk.bf16.mxu0 %vm877_vm0, %v876_v1 }
   0xb   :  { %13 = vsyncpa [#allocation3], 0  ;;  %v684_v6 = vld [vmem:[%s1086_s5] ss:$0 sm:$0xff]  ;;  %s878_s13 = smov 96   ;;  %s879_s14 = smov 64  }
   0xc   :  { %vm244_vm2 = vcmask 1043456   ;;  %vm218_vm3 = vcmask 64512   ;;  %v824_v49 = vld [vmem:[%s1083_s2] sm:$0xff]   ;;  %v825_v50 = vld [vmem:[%s1083_s2 + $0x8] sm:$0xff]   ;;  %s880_s22 = smov [#allocation2]  }
   0xd   :  { %v696_v5 = vld [vmem:[%s1088_s7] ss:$0 sm:$0xff]  ;;  %s673_s23 = sshll.u32 %s880_s22, 4  ;;  %s674_s23 = int_to_ptr.vmem [resolvable:$true] %s673_s23 }
   0xe   :  { %s852_s24 = scalar_lea.vmem %s674_s23, 256  ;;  %p857_p1 = scmp.lt.s32.totalorder %s674_s23, %s674_s23 }
   0xf   :  { %p853_p0 = scmp.ne.s32.totalorder %s674_s23, %s852_s24  ;;  %p858_p2 = scmp.lt.s32.totalorder %s852_s24, %s852_s24 }
  0x11   :  { %p859_p3 = por %p858_p2, %p857_p1 }
  0x13   :  { %p860_p4 = pnand %p859_p3, %p853_p0 }
  0xdc   :  { %v101_v7 = vpop.f32.mrb[0].mxu0 }
  0xdd   :  { %v102_v8 = vadd.f32 %v684_v6, %v101_v7  ;;  %v753_v9 = vpop.f32.mrb[1].mxu0 }
  0xde   :  { %v104_v10 = vpop.f32.mrb[2].mxu0 }
  0xdf   :  { %v105_v11 = vadd.f32 %v684_v6, %v104_v10  ;;  %v754_v12 = vpop.f32.mrb[3].mxu0  ;;  %v719_v13 = vpack.c.bf16 %v102_v8, %v102_v8  ;;  %v108_v17 = vmul.f32 0.17677669, %v102_v8 }
  0xe1   :  { %121 = vrot.lane.b32.xlu0 %v719_v13, %s878_s13  ;;  %v720_v14 = vpack.c.bf16 %v105_v11, %v105_v11  ;;  %v717_v19 = vpack.c.bf16 %v108_v17, %v108_v17  ;;  %v109_v23 = vmul.f32 0.17677669, %v105_v11 }
  0xe3   :  { %v718_v24 = vpack.c.bf16 %v109_v23, %v109_v23 }
  0xe5   :  { %170 = vrot.lane.b32.xlu0 %v720_v14, %s878_s13 }
  0xe9   :  { %239 = vrot.lane.b32.xlu0 %v719_v13, %s879_s14 }
 0x153   :  { %v122_v15 = vpop.permute.xlu0 %121 }
 0x154   :  { %v127_v16 = vsel %vm63_vm1, %v122_v15, 0 }
 0x155   :  { %756 = vmatpush3.bf16.xpose.msra.mxu0 %v127_v16 }
 0x156   :  { %761 = vmatprep.subr.bf16.mxu0 %v876_v1 }
 0x157   :  { %v171_v18 = vpop.permute.xlu0 %170 }
 0x158   :  { %v176_v21 = vsel %vm63_vm1, %v171_v18, 0 }
 0x15b   :  { %v240_v20 = vpop.permute.xlu0 %239 }
 0x15c   :  { %758 = vmatmul.mubr.msk.bf16.vlgmr.msra.gmra.mrb[4].mxu0 %vm63_vm1, %v717_v19  ;;  %v246_v22 = vsel %vm244_vm2, %v240_v20, 0 }
 0x15d   :  { %762 = vmatpush3.bf16.xpose.msra.mxu0 %v176_v21  ;;  %768 = vmatpush3.bf16.msra.mxu1 %v246_v22 }
 0x15e   :  { %763 = vmatprep.mubr.msk.bf16.mxu0 %vm877_vm0, %v876_v1  ;;  %773 = vmatprep.subr.bf16.mxu0 %v876_v1 }
 0x15f   :  { %779 = vmatprep.subr.bf16.mxu1 %v876_v1 }
 0x164   :  { %764 = vmatmul.mubr.msk.bf16.vlgmr.msra.gmra.mrb[8].mxu0 %vm63_vm1, %v718_v24 }
 0x165   :  { %775 = vmatprep.mubr.msk.bf16.mxu0 %vm877_vm0, %v876_v1 }
 0x22f   :  { %v163_v25 = vpop.f32.mrb[4].mxu0 }
 0x230   :  { %v759_v26 = vpop.f32.mrb[5].mxu0  ;;  %v219_v27 = vsel %vm218_vm3, %v163_v25, -inf }
 0x231   :  { %220 = vmax.xlane.f32.xlu1 %v219_v27  ;;  %v166_v28 = vpop.f32.mrb[6].mxu0  ;;  %v828_v26 = vld [vmem:[%s1085_s4] sm:$0xff]   ;;  %v829_v27 = vld [vmem:[%s1085_s4 + $0x8] sm:$0xff]  }
 0x232   :  { %v760_v29 = vpop.f32.mrb[7].mxu0  ;;  %v830_v28 = vld [vmem:[%s1085_s4 + $0x10] sm:$0xff]  }
 0x233   :  { %v831_v29 = vld [vmem:[%s1085_s4 + $0x18] sm:$0xff]  }
 0x237   :  { %v212_v30 = vpop.f32.mrb[8].mxu0 }
 0x238   :  { %v765_v31 = vpop.f32.mrb[9].mxu0  ;;  %v222_v32 = vsel %vm218_vm3, %v212_v30, -inf }
 0x239   :  { %223 = vmax.xlane.f32.xlu1 %v222_v32  ;;  %v215_v33 = vpop.f32.mrb[10].mxu0  ;;  %v833_v31 = vld [vmem:[%s1085_s4 + $0x28] sm:$0xff]  }
 0x23a   :  { %v766_v34 = vpop.f32.mrb[11].mxu0 }
 0x24a   :  { %288 = vrot.lane.b32.xlu1 %v720_v14, %s879_s14 }
 0x2be   :  { %v221_v35 = vpop.xlane.xlu1 %220 }
 0x2bf   :  { %v225_v36 = vsub.f32 %v163_v25, %v221_v35  ;;  %v827_v25 = vld [vmem:[%s1084_s3 + $0x8] sm:$0xff]  }
 0x2c1   :  { %v227_v37 = vmul.f32 1.442695, %v225_v36 }
 0x2c3   :  { %836 = vpow2.f32 %v227_v37 }
 0x2c6   :  { %v224_v38 = vpop.xlane.xlu1 %223 }
 0x2c7   :  { %v226_v39 = vsub.f32 %v212_v30, %v224_v38  ;;  %v832_v30 = vld [vmem:[%s1085_s4 + $0x20] sm:$0xff]  }
 0x2c9   :  { %v229_v40 = vmul.f32 1.442695, %v226_v39 }
 0x2ca   :  { %v289_v41 = vpop.permute.xlu1 %288 }
 0x2cb   :  { %838 = vpow2.f32 %v229_v40  ;;  %v294_v42 = vsel %vm244_vm2, %v289_v41, 0  ;;  %v700_v40 = vld [vmem:[%s1088_s7 + $0x2] ss:$0 sm:$0xff] }
 0x2cc   :  { %774 = vmatpush3.bf16.msra.mxu0 %v294_v42 }
 0x2cd   :  { %v837_v43 = vpop.eup %836  ;;  %787 = vmatprep.subr.bf16.mxu0 %v876_v1 }
 0x2ce   :  { %v231_v44 = vsel %vm218_vm3, %v837_v43, 0.0  ;;  %v237_v45 = vpack.c.bf16 %v837_v43, %v837_v43 }
 0x2cf   :  { %232 = vadd.xlane.f32.xlu0 %v231_v44  ;;  %v701_v44 = vld [vmem:[%s1088_s7 + $0x3] ss:$0 sm:$0xff] }
 0x2d0   :  { %770 = vmatmul.mubr.msk.bf16.vlgmr.msra.gmra.mrb[0].mxu1 %vm218_vm3, %v237_v45 }
 0x2d1   :  { %783 = vmatprep.mubr.msk.bf16.mxu1 %vm877_vm0, %v876_v1  ;;  %780 = vmatpush3.bf16.msra.mxu1 %v824_v49  ;;  %v834_v49 = vld [vmem:[%s1085_s4 + $0x30] sm:$0xff]  }
 0x2d2   :  { %781 = vmatprep.subr.bf16.mxu1 %v876_v1 }
 0x2d5   :  { %v839_v46 = vpop.eup %838  ;;  %782 = vmatpush3.bf16.msra.mxu1 %v825_v50  ;;  %v835_v50 = vld [vmem:[%s1085_s4 + $0x38] sm:$0xff]  }
 0x2d6   :  { %v234_v47 = vsel %vm218_vm3, %v839_v46, 0.0  ;;  %v238_v48 = vpack.c.bf16 %v839_v46, %v839_v46  ;;  %795 = vmatprep.subr.bf16.mxu1 %v876_v1 }
 0x2d7   :  { %235 = vadd.xlane.f32.xlu1 %v234_v47 }
 0x2d8   :  { %776 = vmatmul.mubr.msk.bf16.vlgmr.msra.gmra.mrb[12].mxu0 %vm218_vm3, %v238_v48 }
 0x2d9   :  { %791 = vmatprep.mubr.msk.bf16.mxu0 %vm877_vm0, %v876_v1 }
 0x35c   :  { %v233_v51 = vpop.xlane.xlu0 %232 }
 0x35d   :  { %840 = vrcp.f32 %v233_v51  ;;  %v702_v51 = vld [vmem:[%s1087_s6] ss:$0 sm:$0xff] }
 0x364   :  { %v236_v52 = vpop.xlane.xlu1 %235 }
 0x365   :  { %842 = vrcp.f32 %v236_v52 }
 0x367   :  { %v841_v57 = vpop.eup %840 }
 0x36f   :  { %v843_v58 = vpop.eup %842 }
 0x3a3   :  { %v282_v53 = vpop.f32.mrb[0].mxu1 }
 0x3a4   :  { %v771_v54 = vpop.f32.mrb[1].mxu1  ;;  %v338_v60 = vmul.f32 %v841_v57, %v282_v53 }
 0x3a5   :  { %v285_v55 = vpop.f32.mrb[2].mxu1 }
 0x3a6   :  { %v772_v56 = vpop.f32.mrb[3].mxu1 }
 0x3ab   :  { %v330_v59 = vpop.f32.mrb[12].mxu0 }
 0x3ac   :  { %v339_v61 = vmul.f32 %v843_v58, %v330_v59  ;;  %v777_v62 = vpop.f32.mrb[13].mxu0 }
 0x3ad   :  { %v333_v63 = vpop.f32.mrb[14].mxu0 }
 0x3ae   :  { %v340_v0 = vpack.c.bf16 %v339_v61, %v338_v60  ;;  %v778_v2 = vpop.f32.mrb[15].mxu0 }
 0x3b0   :  { %784 = vmatmul.mubr.msk.bf16.vlgmr.msra.gmra.mrb[4].mxu1 %vm63_vm1, %v340_v0 }
 0x3b1   :  { %811 = vmatprep.mubr.msk.bf16.mxu1 %vm877_vm0, %v876_v1  ;;  %796 = vmatpush3.bf16.msra.mxu1 %v828_v26 }
 0x3b2   :  { %797 = vmatprep.subr.bf16.mxu1 %v876_v1 }
 0x3b5   :  { %798 = vmatpush3.bf16.msra.mxu1 %v829_v27 }
 0x3b6   :  { %799 = vmatprep.subr.bf16.mxu1 %v876_v1 }
 0x3b9   :  { %800 = vmatpush3.bf16.msra.mxu1 %v830_v28  ;;  %v716_v28 = vld [vmem:[%s1088_s7 + $0x5] ss:$0 sm:$0xff] }
 0x3ba   :  { %801 = vmatprep.subr.bf16.mxu1 %v876_v1 }
 0x3bd   :  { %802 = vmatpush3.bf16.msra.mxu1 %v831_v29 }
 0x3be   :  { %803 = vmatprep.subr.bf16.mxu1 %v876_v1 }
 0x3c1   :  { %804 = vmatpush3.bf16.msra.mxu1 %v832_v30 }
 0x3c2   :  { %805 = vmatprep.subr.bf16.mxu1 %v876_v1 }
 0x3c5   :  { %806 = vmatpush3.bf16.msra.mxu1 %v833_v31 }
 0x3c6   :  { %807 = vmatprep.subr.bf16.mxu1 %v876_v1 }
 0x3c9   :  { %808 = vmatpush3.bf16.msra.mxu1 %v834_v49 }
 0x3ca   :  { %809 = vmatprep.subr.bf16.mxu1 %v876_v1 }
 0x3cd   :  { %810 = vmatpush3.bf16.msra.mxu1 %v835_v50 }
 0x483   :  { %v398_v6 = vpop.f32.mrb[4].mxu1 }
 0x484   :  { %v399_v7 = vadd.f32 %v696_v5, %v398_v6  ;;  %v785_v8 = vpop.f32.mrb[5].mxu1 }
 0x485   :  { %v401_v9 = vpop.f32.mrb[6].mxu1 }
 0x486   :  { %v402_v10 = vadd.f32 %v696_v5, %v401_v9  ;;  %v786_v11 = vpop.f32.mrb[7].mxu1  ;;  %v405_v12 = vadd.f32 %v399_v7, %v941_v3 }
 0x488   :  { %v407_v13 = vsel %vm63_vm1, %v405_v12, 0.0  ;;  %v406_v14 = vadd.f32 %v402_v10, %v946_v4  ;;  %v826_v4 = vld [vmem:[%s1084_s3] sm:$0xff]  }
 0x489   :  { %408 = vadd.xlane.f32.xlu0 %v407_v13  ;;  %788 = vmatpush3.bf16.msra.mxu0 %v826_v4 }
 0x48a   :  { %v410_v15 = vsel %vm63_vm1, %v406_v14, 0.0  ;;  %789 = vmatprep.subr.bf16.mxu0 %v876_v1  ;;  %v706_v1 = vld [vmem:[%s1088_s7 + $0x1] ss:$0 sm:$0xff] }
 0x48d   :  { %411 = vadd.xlane.f32.xlu0 %v410_v15  ;;  %790 = vmatpush3.bf16.msra.mxu0 %v827_v25  ;;  %v715_v25 = vld [vmem:[%s1088_s7 + $0x4] ss:$0 sm:$0xff] }
 0x516   :  { %v409_v16 = vpop.xlane.xlu0 %408 }
 0x517   :  { %v414_v17 = vmul.f32 0.03125, %v409_v16 }
 0x519   :  { %v416_v18 = vsub.f32 %v405_v12, %v414_v17 }
 0x51a   :  { %v412_v19 = vpop.xlane.xlu0 %411 }
 0x51b   :  { %v415_v20 = vmul.f32 0.03125, %v412_v19  ;;  %v418_v21 = vmul.f32 %v416_v18, %v416_v18 }
 0x51d   :  { %v417_v22 = vsub.f32 %v406_v14, %v415_v20  ;;  %v420_v23 = vsel %vm63_vm1, %v418_v21, 0.0 }
 0x51e   :  { %421 = vadd.xlane.f32.xlu0 %v420_v23 }
 0x51f   :  { %v419_v24 = vmul.f32 %v417_v22, %v417_v22 }
 0x521   :  { %v423_v3 = vsel %vm63_vm1, %v419_v24, 0.0 }
 0x522   :  { %424 = vadd.xlane.f32.xlu0 %v423_v3 }
 0x5ab   :  { %v422_v32 = vpop.xlane.xlu0 %421 }
 0x5ac   :  { %v426_v33 = vmul.f32 0.03125, %v422_v32 }
 0x5ae   :  { %v428_v34 = vadd.f32 1e-05, %v426_v33 }
 0x5af   :  { %v425_v35 = vpop.xlane.xlu0 %424 }
 0x5b0   :  { %844 = vrsqrt.f32 %v428_v34  ;;  %v427_v36 = vmul.f32 0.03125, %v425_v35 }
 0x5b2   :  { %v429_v37 = vadd.f32 1e-05, %v427_v36 }
 0x5b4   :  { %846 = vrsqrt.f32 %v429_v37 }
 0x5ba   :  { %v845_v38 = vpop.eup %844 }
 0x5bb   :  { %v432_v39 = vmul.f32 %v845_v38, %v416_v18 }
 0x5bd   :  { %v438_v42 = vmul.f32 %v700_v40, %v432_v39 }
 0x5be   :  { %v847_v41 = vpop.eup %846 }
 0x5bf   :  { %v433_v43 = vmul.f32 %v847_v41, %v417_v22  ;;  %v444_v46 = vadd.f32 %v701_v44, %v438_v42 }
 0x5c1   :  { %v439_v45 = vmul.f32 %v700_v40, %v433_v43 }
 0x5c3   :  { %v445_v47 = vadd.f32 %v701_v44, %v439_v45 }
 0x5c5   :  { %v446_v48 = vpack.c.bf16 %v445_v47, %v444_v46 }
 0x5c7   :  { %792 = vmatmul.mubr.msk.bf16.vlgmr.msra.gmra.mrb[16].mxu0 %vm63_vm1, %v446_v48 }
 0x69a   :  { %v507_v52 = vpop.f32.mrb[16].mxu0 }
 0x69b   :  { %v508_v53 = vadd.f32 %v702_v51, %v507_v52  ;;  %v793_v54 = vpop.f32.mrb[17].mxu0 }
 0x69c   :  { %v510_v55 = vpop.f32.mrb[18].mxu0 }
 0x69d   :  { %v511_v56 = vadd.f32 %v702_v51, %v510_v55  ;;  %v794_v57 = vpop.f32.mrb[19].mxu0  ;;  %v514_v58 = vmax.f32 %v508_v53, 0.0 }
 0x69f   :  { %v515_v59 = vmax.f32 %v511_v56, 0.0 }
 0x6a1   :  { %v516_v60 = vpack.c.bf16 %v515_v59, %v514_v58 }
 0x6a3   :  { %812 = vmatmul.mubr.bf16.vlgmr.msra.gmra.mrb[8].mxu1 %v516_v60 }
 0x776   :  { %v619_v61 = vpop.f32.mrb[8].mxu1 }
 0x777   :  { %v620_v62 = vadd.f32 %v706_v1, %v619_v61  ;;  %v813_v63 = vpop.f32.mrb[9].mxu1 }
 0x778   :  { %v622_v0 = vpop.f32.mrb[10].mxu1 }
 0x779   :  { %v623_v2 = vadd.f32 %v706_v1, %v622_v0  ;;  %v814_v5 = vpop.f32.mrb[11].mxu1  ;;  %v626_v6 = vadd.f32 %v620_v62, %v444_v46 }
 0x77b   :  { %v628_v7 = vsel %vm63_vm1, %v626_v6, 0.0  ;;  %v627_v8 = vadd.f32 %v623_v2, %v445_v47 }
 0x77c   :  { %629 = vadd.xlane.f32.xlu0 %v628_v7 }
 0x77d   :  { %v631_v9 = vsel %vm63_vm1, %v627_v8, 0.0 }
 0x77e   :  { %632 = vadd.xlane.f32.xlu1 %v631_v9 }
 0x809   :  { %v630_v10 = vpop.xlane.xlu0 %629 }
 0x80a   :  { %v634_v11 = vmul.f32 0.03125, %v630_v10 }
 0x80b   :  { %v633_v12 = vpop.xlane.xlu1 %632 }
 0x80c   :  { %v636_v13 = vsub.f32 %v626_v6, %v634_v11  ;;  %v635_v14 = vmul.f32 0.03125, %v633_v12 }
 0x80e   :  { %v637_v15 = vsub.f32 %v627_v8, %v635_v14  ;;  %v638_v16 = vmul.f32 %v636_v13, %v636_v13 }
 0x810   :  { %v640_v17 = vsel %vm63_vm1, %v638_v16, 0.0  ;;  %v639_v18 = vmul.f32 %v637_v15, %v637_v15 }
 0x811   :  { %641 = vadd.xlane.f32.xlu0 %v640_v17 }
 0x812   :  { %v643_v19 = vsel %vm63_vm1, %v639_v18, 0.0 }
 0x813   :  { %644 = vadd.xlane.f32.xlu1 %v643_v19 }
 0x89e   :  { %v642_v20 = vpop.xlane.xlu0 %641 }
 0x89f   :  { %v646_v21 = vmul.f32 0.03125, %v642_v20 }
 0x8a0   :  { %v645_v22 = vpop.xlane.xlu1 %644 }
 0x8a1   :  { %v648_v23 = vadd.f32 1e-05, %v646_v21  ;;  %v647_v24 = vmul.f32 0.03125, %v645_v22 }
 0x8a3   :  { %848 = vrsqrt.f32 %v648_v23  ;;  %v649_v3 = vadd.f32 1e-05, %v647_v24 }
 0x8a5   :  { %850 = vrsqrt.f32 %v649_v3 }
 0x8ad   :  { %v849_v4 = vpop.eup %848 }
 0x8ae   :  { %v652_v26 = vmul.f32 %v849_v4, %v636_v13 }
 0x8af   :  { %v851_v27 = vpop.eup %850 }
 0x8b0   :  { %v653_v29 = vmul.f32 %v851_v27, %v637_v15  ;;  %v658_v30 = vmul.f32 %v715_v25, %v652_v26 }
 0x8b2   :  { %v659_v31 = vmul.f32 %v715_v25, %v653_v29  ;;  %v664_v32 = vadd.f32 %v716_v28, %v658_v30 }
 0x8b4   :  { %v665_v33 = vadd.f32 %v716_v28, %v659_v31  ;;  %666 = vst.msk [vmem:[#allocation2] sm:$0xff] %vm63_vm1, %v664_v32 }
 0x8b6   :  { %667 = vst.msk [vmem:[#allocation2 + $0x8] sm:$0xff] %vm63_vm1, %v665_v33 }
 0x8b7   :  { %863 = shalt.err (!%p860_p4)
}
 0x8b8   :  { %s864_s26 = scalar_lea.hbm %s1089_s8, 256 }
 0x8b9   :  { %p865_p5 = scmp.ne.s32.totalorder %s1089_s8, %s864_s26  ;;  %p868_p6 = scmp.lt.u32.totalorder %s864_s26, %s1089_s8 }
 0x8bb   :  { %p870_p7 = pnand %p868_p6, %p865_p5 }
 0x8bd   :  { %873 = shalt.err (!%p870_p7)
}
 0x8be   :  { %s881_s30 = smov 128   ;;  %s882_s9 = smov 8  }
 0x8bf   :  { %679 = dma.vmem_to_hbm [thread:$0]  %s674_s23, 256, %s1089_s8, [#allocation3], %s881_s30, %s881_s30, %s882_s9  }
 0x8c0   :  { %874 = dma.done.wait [#allocation3], 256  }
 0x8c1   :  { %875 = vsyncadd [#allocation3], 4294967040 }
 0x8c2   :  { %683 = vsyncpa [#allocation3], 1 }

</bundles_post_ra>
